<compile_context>
chip_gen: v7x
topology: tpu7x:2x2x1
jax: 0.10.0
libtpu: 0.0.40
codegen_flags: <defaults>
</compile_context>

<pallas_src>
import functools

import jax
import jax.numpy as jnp
from jax import lax
from jax.experimental import pallas as pl
from jax.experimental.pallas import tpu as pltpu


def _round_up(x, m):
    return (x + m - 1) // m * m


def _vmem_capacity_bytes():
    """Per-TensorCore VMEM capacity (conservative fallback = 64 MiB)."""
    try:
        return int(pltpu.get_tpu_info().vmem_capacity_bytes)
    except Exception:
        pass
    kind = ""
    try:
        kind = jax.devices()[0].device_kind.lower()
    except Exception:
        pass
    if "v5" in kind or "v6" in kind:
        return 128 * 1024 * 1024
    return 64 * 1024 * 1024  # v7x / unknown


def _bf16_eup_supported():
    """bf16 VPU/EUP exists on v6e/v7x; not on v5e and earlier."""
    try:
        kind = jax.devices()[0].device_kind.lower()
    except Exception:
        return False
    if not kind:
        return False
    return not any(v in kind for v in ("v2", "v3", "v4", "v5"))


def _choose_tc(T, Bt, E, Hp, Op, vmem_limit, sub):
    """Largest time-chunk that fits the VMEM budget."""
    b16, b32 = 2, 4
    # Weights/biases (double-buffered by the BlockSpec pipeline).
    w_bytes = 2 * (E * 4 * Hp * b16 + Hp * 4 * Hp * b16 + Hp * Op * b16
                   + 4 * Hp * b32 + Op * b32)
    # Recurrent state + double-buffered output block.
    state_bytes = 2 * Bt * Hp * b32 + 2 * Bt * Op * b32
    # Live sub-chunk dot result while filling gx_scr.
    sub_bytes = sub * Bt * 4 * Hp * b32
    margin = 4 * 1024 * 1024  # compiler-internal scratch / per-step spill slack
    per_tc = Bt * 4 * Hp * b32 + 2 * Bt * E * b16  # gx_scr + double-buffered emb
    avail = vmem_limit - w_bytes - state_bytes - sub_bytes - margin
    tc = max(1, avail // per_tc)
    return int(min(tc, T, 256))


def _lstm_fc_kernel(emb_ref, wih_ref, whh_ref, b_ref, wfc_ref, bfc_ref,
                    out_ref, h_scr, c_scr, gx_scr,
                    *, Tc, Hp, T, sub, unroll, act_bf16):
    # emb_ref : (Tc, Bt, E)   bf16   time-chunk of embedded tokens
    # wih_ref : (E, 4Hp)      bf16   gate layout [i, f, o, g]
    # whh_ref : (Hp, 4Hp)     bf16
    # b_ref   : (1, 4Hp)      f32    combined bias (b_ih + b_hh)
    # wfc_ref : (Hp, Op)      bf16
    # bfc_ref : (1, Op)       f32
    # out_ref : (Bt, Op)      f32    lane-dense logits block
    # h_scr/c_scr : (Bt, Hp)  f32    recurrent state, carried across t-chunks
    # gx_scr  : (Tc, Bt, 4Hp) f32    precomputed input projection (+bias)
    t_idx = pl.program_id(1)
    Bt = out_ref.shape[0]
    E = emb_ref.shape[2]

    @pl.when(t_idx == 0)
    def _():
        h_scr[...] = jnp.zeros_like(h_scr)
        c_scr[...] = jnp.zeros_like(c_scr)

    # Hoisted input projection: MXU matmuls over sub-chunks of timesteps,
    # written directly into gx_scr so no Tc-sized intermediate is ever live.
    for s0 in range(0, Tc, sub):
        sz = min(sub, Tc - s0)
        x_blk = emb_ref[pl.ds(s0, sz)].reshape(sz * Bt, E)          # bf16
        g_blk = jnp.dot(x_blk, wih_ref[...],
                        preferred_element_type=jnp.float32) + b_ref[...]
        gx_scr[pl.ds(s0, sz)] = g_blk.reshape(sz, Bt, 4 * Hp)

    t_base = t_idx * Tc

    def step(s, carry):
        h, c = carry  # f32 (Bt, Hp)
        gates = gx_scr[s] + jnp.dot(h.astype(jnp.bfloat16), whh_ref[...],
                                    preferred_element_type=jnp.float32)
        pre = gates.astype(jnp.bfloat16) if act_bf16 else gates
        # Gate layout [i, f, o | g]; sigmoid written in tanh form so each
        # element costs a single EUP op.  Slices are lane-aligned (mult. of 128).
        ifo = 0.5 * (jnp.tanh(0.5 * pre[:, : 3 * Hp]) + 1.0)
        g_g = jnp.tanh(pre[:, 3 * Hp:]).astype(jnp.float32)
        i_g = ifo[:, :Hp].astype(jnp.float32)
        f_g = ifo[:, Hp: 2 * Hp].astype(jnp.float32)
        o_g = ifo[:, 2 * Hp:].astype(jnp.float32)
        c_new = f_g * c + i_g * g_g
        h_new = o_g * jnp.tanh(c_new)
        # Mask timesteps beyond the true sequence length (last, partial chunk).
        valid = (t_base + s) < T
        h_new = jnp.where(valid, h_new, h)
        c_new = jnp.where(valid, c_new, c)
        return h_new, c_new

    h_t, c_t = lax.fori_loop(0, Tc, step, (h_scr[...], c_scr[...]),
                             unroll=unroll)
    h_scr[...] = h_t
    c_scr[...] = c_t

    @pl.when(t_idx == pl.num_programs(1) - 1)
    def _():
        out_ref[...] = (
            jnp.dot(h_t.astype(jnp.bfloat16), wfc_ref[...],
                    preferred_element_type=jnp.float32)
            + bfc_ref[...]
        )


def text_classifier_forward(text, kparams, output_dim):
    """text: (B, T) int32 token ids.  Returns logits (B, output_dim) float32."""
    emb_table = kparams["embedding"]          # (V, E) bf16, pad row zeroed
    w_ih = kparams["w_ih"]                    # (E, 4Hp)  bf16
    w_hh = kparams["w_hh"]                    # (Hp, 4Hp) bf16
    b = kparams["b"]                          # (1, 4Hp)  f32
    w_fc = kparams["w_fc"]                    # (Hp, Op)  bf16
    b_fc = kparams["b_fc"]                    # (1, Op)   f32

    E = emb_table.shape[1]
    Hp = w_hh.shape[0]
    Op = w_fc.shape[1]
    B, T = text.shape

    # Time-major bf16 embedding gather in one shot (no f32 gather + transpose +
    # cast round trips through HBM).
    embedded = jnp.take(emb_table, text.T, axis=0)                  # (T, B, E) bf16

    # Batch tiling: sublane multiple; >=2 tiles when B > 8 so the "parallel"
    # axis can use v7x's second TensorCore; Bt <= 64 keeps per-step vreg
    # pressure low for big batches.
    if B <= 8:
        Bt, num_b = _round_up(B, 8), 1
    elif B <= 128:
        Bt, num_b = _round_up(pl.cdiv(B, 2), 8), 2
    else:
        Bt = 64
        num_b = pl.cdiv(B, Bt)
    Bp = Bt * num_b
    if Bp != B:
        embedded = jnp.pad(embedded, ((0, 0), (0, Bp - B), (0, 0)))

    # VMEM-budgeted time-chunking (no divisibility constraint: padded trailing
    # timesteps are masked inside the kernel).
    sub = 8
    vmem_cap = _vmem_capacity_bytes()
    vmem_limit = int(vmem_cap * 0.85)
    Tc = _choose_tc(T, Bt, E, Hp, Op, vmem_limit, sub)
    sub = min(sub, Tc)
    num_t = pl.cdiv(T, Tc)
    Tp = Tc * num_t
    if Tp != T:
        embedded = jnp.pad(embedded, ((0, Tp - T), (0, 0), (0, 0)))

    # Unroll capped by per-step working-set size to avoid register spills.
    gate_bytes = Bt * 4 * Hp * 4
    if gate_bytes > 128 * 1024:
        unroll = 2
    elif gate_bytes > 64 * 1024:
        unroll = 4
    else:
        unroll = True if Tc <= 32 else 8

    kernel = functools.partial(
        _lstm_fc_kernel, Tc=Tc, Hp=Hp, T=T, sub=sub, unroll=unroll,
        act_bf16=_bf16_eup_supported())

    out = pl.pallas_call(
        kernel,
        out_shape=jax.ShapeDtypeStruct((Bp, Op), jnp.float32),
        grid_spec=pltpu.PrefetchScalarGridSpec(
            num_scalar_prefetch=0,
            grid=(num_b, num_t),
            in_specs=[
                pl.BlockSpec((Tc, Bt, E), lambda bi, ti: (ti, bi, 0)),
                pl.BlockSpec(w_ih.shape, lambda bi, ti: (0, 0)),
                pl.BlockSpec(w_hh.shape, lambda bi, ti: (0, 0)),
                pl.BlockSpec(b.shape, lambda bi, ti: (0, 0)),
                pl.BlockSpec(w_fc.shape, lambda bi, ti: (0, 0)),
                pl.BlockSpec(b_fc.shape, lambda bi, ti: (0, 0)),
            ],
            out_specs=pl.BlockSpec((Bt, Op), lambda bi, ti: (bi, 0)),
            scratch_shapes=[
                pltpu.VMEM((Bt, Hp), jnp.float32),          # h
                pltpu.VMEM((Bt, Hp), jnp.float32),          # c
                pltpu.VMEM((Tc, Bt, 4 * Hp), jnp.float32),  # precomputed x-gates
            ],
        ),
        compiler_params=pltpu.CompilerParams(
            dimension_semantics=("parallel", "arbitrary"),
            vmem_limit_bytes=vmem_limit,
        ),
    )(embedded, w_ih, w_hh, b, w_fc, b_fc)

    return out[:B, :output_dim]


def init_params(key, vocab_size, embedding_dim, hidden_dim, output_dim, pad_idx):
    """Logical-size f32 params with PyTorch-style init and gate order [i,f,g,o]."""
    k_emb, k_wih, k_whh, k_bih, k_bhh, k_wfc, k_bfc = jax.random.split(key, 7)

    emb = jax.random.normal(k_emb, (vocab_size, embedding_dim), jnp.float32)
    emb = emb.at[pad_idx].set(0.0)  # padding_idx row zeroed, as in nn.Embedding

    scale_lstm = 1.0 / jnp.sqrt(hidden_dim)
    # PyTorch stores weight_ih_l0 as (4H, E); we pre-transpose to (E, 4H).
    w_ih = jax.random.uniform(
        k_wih, (embedding_dim, 4 * hidden_dim), jnp.float32, -scale_lstm, scale_lstm)
    w_hh = jax.random.uniform(
        k_whh, (hidden_dim, 4 * hidden_dim), jnp.float32, -scale_lstm, scale_lstm)
    b_ih = jax.random.uniform(
        k_bih, (4 * hidden_dim,), jnp.float32, -scale_lstm, scale_lstm)
    b_hh = jax.random.uniform(
        k_bhh, (4 * hidden_dim,), jnp.float32, -scale_lstm, scale_lstm)
    b = (b_ih + b_hh).reshape(1, 4 * hidden_dim)

    scale_fc = 1.0 / jnp.sqrt(hidden_dim)
    # nn.Linear weight is (O, H); we pre-transpose to (H, O).
    w_fc = jax.random.uniform(
        k_wfc, (hidden_dim, output_dim), jnp.float32, -scale_fc, scale_fc)
    b_fc = jax.random.uniform(
        k_bfc, (1, output_dim), jnp.float32, -scale_fc, scale_fc)

    return {"embedding": emb, "w_ih": w_ih, "w_hh": w_hh, "b": b,
            "w_fc": w_fc, "b_fc": b_fc}


def prepare_params(params, *, hidden_dim, output_dim):
    """One-time repack for the kernel: gate reorder [i,f,g,o]->[i,f,o,g],
    pad H/O to multiples of 128, cast matmul weights + embedding to bf16.
    Zero padding keeps padded hidden units / output columns exactly 0."""
    H = hidden_dim
    Hp = _round_up(H, 128)
    Op = _round_up(output_dim, 128)

    def reorder_pad_gate_cols(w):  # (rows, 4H) [i,f,g,o] -> (rows, 4Hp) [i,f,o,g]
        i, f, g, o = jnp.split(w, 4, axis=-1)
        padded = [jnp.pad(blk, ((0, 0), (0, Hp - H))) for blk in (i, f, o, g)]
        return jnp.concatenate(padded, axis=-1)

    emb = params["embedding"].astype(jnp.bfloat16)                         # (V, E)
    w_ih = reorder_pad_gate_cols(params["w_ih"]).astype(jnp.bfloat16)      # (E, 4Hp)
    w_hh = jnp.pad(reorder_pad_gate_cols(params["w_hh"]),
                   ((0, Hp - H), (0, 0))).astype(jnp.bfloat16)             # (Hp, 4Hp)
    b = reorder_pad_gate_cols(params["b"]).astype(jnp.float32)             # (1, 4Hp)
    w_fc = jnp.pad(params["w_fc"],
                   ((0, Hp - H), (0, Op - output_dim))).astype(jnp.bfloat16)  # (Hp, Op)
    b_fc = jnp.pad(params["b_fc"],
                   ((0, 0), (0, Op - output_dim))).astype(jnp.float32)        # (1, Op)

    return {"embedding": emb, "w_ih": w_ih, "w_hh": w_hh,
            "b": b, "w_fc": w_fc, "b_fc": b_fc}


if __name__ == "__main__":
    vocab_size = 50
    embedding_dim = 16
    hidden_dim = 32
    output_dim = 3
    pad_idx = 0
    batch, seq = 2, 8

    key = jax.random.PRNGKey(0)
    k_params, k_text = jax.random.split(key)

    params = init_params(k_params, vocab_size, embedding_dim, hidden_dim,
                         output_dim, pad_idx)
    kparams = prepare_params(params, hidden_dim=hidden_dim, output_dim=output_dim)
    text = jax.random.randint(k_text, (batch, seq), 0, vocab_size, dtype=jnp.int32)

    # TODO(synk): no length masking (matches the reference, which feeds the raw
    # padded sequence to nn.LSTM without pack_padded_sequence).
    logits = text_classifier_forward(text, kparams, output_dim)
    jax.block_until_ready(logits)
    assert logits.shape == (batch, output_dim)
    assert logits.dtype == jnp.float32
    print("KERNEL_OK")
</pallas_src>

<mosaic_0001>
module attributes {stable_mosaic.version = 11 : i64} {
  func.func @_lstm_fc_kernel(%arg0: i32, %arg1: i32, %arg2: memref<8x8x16xbf16, #tpu.memory_space<vmem>>, %arg3: memref<16x512xbf16, #tpu.memory_space<vmem>>, %arg4: memref<128x512xbf16, #tpu.memory_space<vmem>>, %arg5: memref<1x512xf32, #tpu.memory_space<vmem>>, %arg6: memref<128x128xbf16, #tpu.memory_space<vmem>>, %arg7: memref<1x128xf32, #tpu.memory_space<vmem>>, %arg8: memref<8x128xf32, #tpu.memory_space<vmem>>, %arg9: memref<8x128xf32, #tpu.memory_space<vmem>>, %arg10: memref<8x128xf32, #tpu.memory_space<vmem>>, %arg11: memref<8x8x512xf32, #tpu.memory_space<vmem>>) attributes {dimension_semantics = [#tpu.dimension_semantics<parallel>, #tpu.dimension_semantics<arbitrary>], iteration_bounds = array<i64: 1, 1>, scalar_prefetch = 0 : i64, scratch_operands = 3 : i64, tpu.core_type = #tpu.core_type<tc>, window_params = [{transform_indices = @transform_0, window_bounds = array<i64: 8, 8, 16>}, {pipeline_mode = #tpu.pipeline_mode<synchronous>, transform_indices = @transform_1, window_bounds = array<i64: 16, 512>}, {pipeline_mode = #tpu.pipeline_mode<synchronous>, transform_indices = @transform_2, window_bounds = array<i64: 128, 512>}, {pipeline_mode = #tpu.pipeline_mode<synchronous>, transform_indices = @transform_3, window_bounds = array<i64: 1, 512>}, {pipeline_mode = #tpu.pipeline_mode<synchronous>, transform_indices = @transform_4, window_bounds = array<i64: 128, 128>}, {pipeline_mode = #tpu.pipeline_mode<synchronous>, transform_indices = @transform_5, window_bounds = array<i64: 1, 128>}, {transform_indices = @transform_6, window_bounds = array<i64: 8, 128>}]} {
    %c0_i32 = arith.constant 0 : i32
    %0 = arith.cmpi eq, %arg1, %c0_i32 : i32
    %1 = arith.extui %0 : i1 to i32
    %c0_i32_0 = arith.constant 0 : i32
    %2 = arith.cmpi ne, %1, %c0_i32_0 : i32
    scf.if %2 {
      %cst_94 = arith.constant 0.000000e+00 : f32
      %292 = vector.broadcast %cst_94 : f32 to vector<8x128xf32>
      %c0_95 = arith.constant 0 : index
      %c0_96 = arith.constant 0 : index
      %293 = vector.load %arg9[%c0_95, %c0_96] : memref<8x128xf32, #tpu.memory_space<vmem>>, vector<8x128xf32>
      tpu.vector_store %arg9[%c0_95, %c0_96], %292 {strides = array<i32>} : memref<8x128xf32, #tpu.memory_space<vmem>>, vector<8x128xf32>,
      %cst_97 = arith.constant 0.000000e+00 : f32
      %294 = vector.broadcast %cst_97 : f32 to vector<8x128xf32>
      %c0_98 = arith.constant 0 : index
      %c0_99 = arith.constant 0 : index
      %295 = vector.load %arg10[%c0_98, %c0_99] : memref<8x128xf32, #tpu.memory_space<vmem>>, vector<8x128xf32>
      tpu.vector_store %arg10[%c0_98, %c0_99], %294 {strides = array<i32>} : memref<8x128xf32, #tpu.memory_space<vmem>>, vector<8x128xf32>,
    } else {
    }
    %c0 = arith.constant 0 : index
    %c0_1 = arith.constant 0 : index
    %c0_2 = arith.constant 0 : index
    %3 = vector.load %arg2[%c0, %c0_1, %c0_2] : memref<8x8x16xbf16, #tpu.memory_space<vmem>>, vector<8x8x16xbf16>
    %4 = vector.shape_cast %3 : vector<8x8x16xbf16> to vector<64x16xbf16>
    %c0_3 = arith.constant 0 : index
    %c0_4 = arith.constant 0 : index
    %5 = vector.load %arg3[%c0_3, %c0_4] : memref<16x512xbf16, #tpu.memory_space<vmem>>, vector<16x512xbf16>
    %cst = arith.constant dense<0.000000e+00> : vector<64x512xf32>
    %6 = tpu.matmul %4, %5, %cst {dimension_numbers = #tpu.dot_dimension_numbers<[1], [0], [0], [1], [0, 0, 1, 1], [], []>} : vector<64x16xbf16>, vector<16x512xbf16>, vector<64x512xf32> -> vector<64x512xf32>
    %c0_5 = arith.constant 0 : index
    %c0_6 = arith.constant 0 : index
    %7 = vector.load %arg5[%c0_5, %c0_6] : memref<1x512xf32, #tpu.memory_space<vmem>>, vector<1x512xf32>
    %8 = vector.broadcast %7 : vector<1x512xf32> to vector<64x512xf32>
    %9 = arith.addf %6, %8 : vector<64x512xf32>
    %10 = vector.shape_cast %9 : vector<64x512xf32> to vector<8x8x512xf32>
    %c0_7 = arith.constant 0 : index
    %c0_8 = arith.constant 0 : index
    %c0_9 = arith.constant 0 : index
    %11 = vector.load %arg11[%c0_7, %c0_8, %c0_9] : memref<8x8x512xf32, #tpu.memory_space<vmem>>, vector<8x8x512xf32>
    tpu.vector_store %arg11[%c0_7, %c0_8, %c0_9], %10 {strides = array<i32>} : memref<8x8x512xf32, #tpu.memory_space<vmem>>, vector<8x8x512xf32>,
    %c8_i32 = arith.constant 8 : i32
    %12 = arith.muli %arg1, %c8_i32 : i32
    %c0_10 = arith.constant 0 : index
    %c0_11 = arith.constant 0 : index
    %13 = vector.load %arg9[%c0_10, %c0_11] : memref<8x128xf32, #tpu.memory_space<vmem>>, vector<8x128xf32>
    %c0_12 = arith.constant 0 : index
    %c0_13 = arith.constant 0 : index
    %14 = vector.load %arg10[%c0_12, %c0_13] : memref<8x128xf32, #tpu.memory_space<vmem>>, vector<8x128xf32>
    %c0_i32_14 = arith.constant 0 : i32
    %15 = arith.index_cast %c0_i32_14 : i32 to index
    %c0_15 = arith.constant 0 : index
    %c0_16 = arith.constant 0 : index
    %16 = vector.load %arg11[%15, %c0_15, %c0_16] : memref<8x8x512xf32, #tpu.memory_space<vmem>>, vector<1x8x512xf32>
    %17 = vector.shape_cast %16 : vector<1x8x512xf32> to vector<8x512xf32>
    %18 = arith.truncf %13 : vector<8x128xf32> to vector<8x128xbf16>
    %c0_17 = arith.constant 0 : index
    %c0_18 = arith.constant 0 : index
    %19 = vector.load %arg4[%c0_17, %c0_18] : memref<128x512xbf16, #tpu.memory_space<vmem>>, vector<128x512xbf16>
    %cst_19 = arith.constant dense<0.000000e+00> : vector<8x512xf32>
    %20 = tpu.matmul %18, %19, %cst_19 {dimension_numbers = #tpu.dot_dimension_numbers<[1], [0], [0], [1], [0, 0, 1, 1], [], []>} : vector<8x128xbf16>, vector<128x512xbf16>, vector<8x512xf32> -> vector<8x512xf32>
    %21 = arith.addf %17, %20 : vector<8x512xf32>
    %22 = arith.truncf %21 : vector<8x512xf32> to vector<8x512xbf16>
    %23 = vector.extract_strided_slice %22 {offsets = [0, 0], sizes = [8, 384], strides = [1, 1]} : vector<8x512xbf16> to vector<8x384xbf16>
    %cst_20 = arith.constant 5.000000e-01 : bf16
    %24 = vector.broadcast %cst_20 : bf16 to vector<8x384xbf16>
    %25 = arith.mulf %24, %23 : vector<8x384xbf16>
    %26 = math.tanh %25 : vector<8x384xbf16>
    %cst_21 = arith.constant 1.000000e+00 : bf16
    %27 = vector.broadcast %cst_21 : bf16 to vector<8x384xbf16>
    %28 = arith.addf %26, %27 : vector<8x384xbf16>
    %cst_22 = arith.constant 5.000000e-01 : bf16
    %29 = vector.broadcast %cst_22 : bf16 to vector<8x384xbf16>
    %30 = arith.mulf %29, %28 : vector<8x384xbf16>
    %31 = vector.extract_strided_slice %22 {offsets = [0, 384], sizes = [8, 128], strides = [1, 1]} : vector<8x512xbf16> to vector<8x128xbf16>
    %32 = math.tanh %31 : vector<8x128xbf16>
    %33 = arith.extf %32 : vector<8x128xbf16> to vector<8x128xf32>
    %34 = vector.extract_strided_slice %30 {offsets = [0, 0], sizes = [8, 128], strides = [1, 1]} : vector<8x384xbf16> to vector<8x128xbf16>
    %35 = arith.extf %34 : vector<8x128xbf16> to vector<8x128xf32>
    %36 = vector.extract_strided_slice %30 {offsets = [0, 128], sizes = [8, 128], strides = [1, 1]} : vector<8x384xbf16> to vector<8x128xbf16>
    %37 = arith.extf %36 : vector<8x128xbf16> to vector<8x128xf32>
    %38 = vector.extract_strided_slice %30 {offsets = [0, 256], sizes = [8, 128], strides = [1, 1]} : vector<8x384xbf16> to vector<8x128xbf16>
    %39 = arith.extf %38 : vector<8x128xbf16> to vector<8x128xf32>
    %40 = arith.mulf %37, %14 : vector<8x128xf32>
    %41 = arith.mulf %35, %33 : vector<8x128xf32>
    %42 = arith.addf %40, %41 : vector<8x128xf32>
    %43 = math.tanh %42 : vector<8x128xf32>
    %44 = arith.mulf %39, %43 : vector<8x128xf32>
    %45 = arith.addi %12, %c0_i32_14 : i32
    %c8_i32_23 = arith.constant 8 : i32
    %46 = arith.cmpi slt, %45, %c8_i32_23 : i32
    %47 = arith.select %46, %44, %13 : vector<8x128xf32>
    %48 = arith.select %46, %42, %14 : vector<8x128xf32>
    %c1_i32 = arith.constant 1 : i32
    %49 = arith.index_cast %c1_i32 : i32 to index
    %c0_24 = arith.constant 0 : index
    %c0_25 = arith.constant 0 : index
    %50 = vector.load %arg11[%49, %c0_24, %c0_25] : memref<8x8x512xf32, #tpu.memory_space<vmem>>, vector<1x8x512xf32>
    %51 = vector.shape_cast %50 : vector<1x8x512xf32> to vector<8x512xf32>
    %52 = arith.truncf %47 : vector<8x128xf32> to vector<8x128xbf16>
    %c0_26 = arith.constant 0 : index
    %c0_27 = arith.constant 0 : index
    %53 = vector.load %arg4[%c0_26, %c0_27] : memref<128x512xbf16, #tpu.memory_space<vmem>>, vector<128x512xbf16>
    %cst_28 = arith.constant dense<0.000000e+00> : vector<8x512xf32>
    %54 = tpu.matmul %52, %53, %cst_28 {dimension_numbers = #tpu.dot_dimension_numbers<[1], [0], [0], [1], [0, 0, 1, 1], [], []>} : vector<8x128xbf16>, vector<128x512xbf16>, vector<8x512xf32> -> vector<8x512xf32>
    %55 = arith.addf %51, %54 : vector<8x512xf32>
    %56 = arith.truncf %55 : vector<8x512xf32> to vector<8x512xbf16>
    %57 = vector.extract_strided_slice %56 {offsets = [0, 0], sizes = [8, 384], strides = [1, 1]} : vector<8x512xbf16> to vector<8x384xbf16>
    %cst_29 = arith.constant 5.000000e-01 : bf16
    %58 = vector.broadcast %cst_29 : bf16 to vector<8x384xbf16>
    %59 = arith.mulf %58, %57 : vector<8x384xbf16>
    %60 = math.tanh %59 : vector<8x384xbf16>
    %cst_30 = arith.constant 1.000000e+00 : bf16
    %61 = vector.broadcast %cst_30 : bf16 to vector<8x384xbf16>
    %62 = arith.addf %60, %61 : vector<8x384xbf16>
    %cst_31 = arith.constant 5.000000e-01 : bf16
    %63 = vector.broadcast %cst_31 : bf16 to vector<8x384xbf16>
    %64 = arith.mulf %63, %62 : vector<8x384xbf16>
    %65 = vector.extract_strided_slice %56 {offsets = [0, 384], sizes = [8, 128], strides = [1, 1]} : vector<8x512xbf16> to vector<8x128xbf16>
    %66 = math.tanh %65 : vector<8x128xbf16>
    %67 = arith.extf %66 : vector<8x128xbf16> to vector<8x128xf32>
    %68 = vector.extract_strided_slice %64 {offsets = [0, 0], sizes = [8, 128], strides = [1, 1]} : vector<8x384xbf16> to vector<8x128xbf16>
    %69 = arith.extf %68 : vector<8x128xbf16> to vector<8x128xf32>
    %70 = vector.extract_strided_slice %64 {offsets = [0, 128], sizes = [8, 128], strides = [1, 1]} : vector<8x384xbf16> to vector<8x128xbf16>
    %71 = arith.extf %70 : vector<8x128xbf16> to vector<8x128xf32>
    %72 = vector.extract_strided_slice %64 {offsets = [0, 256], sizes = [8, 128], strides = [1, 1]} : vector<8x384xbf16> to vector<8x128xbf16>
    %73 = arith.extf %72 : vector<8x128xbf16> to vector<8x128xf32>
    %74 = arith.mulf %71, %48 : vector<8x128xf32>
    %75 = arith.mulf %69, %67 : vector<8x128xf32>
    %76 = arith.addf %74, %75 : vector<8x128xf32>
    %77 = math.tanh %76 : vector<8x128xf32>
    %78 = arith.mulf %73, %77 : vector<8x128xf32>
    %79 = arith.addi %12, %c1_i32 : i32
    %c8_i32_32 = arith.constant 8 : i32
    %80 = arith.cmpi slt, %79, %c8_i32_32 : i32
    %81 = arith.select %80, %78, %47 : vector<8x128xf32>
    %82 = arith.select %80, %76, %48 : vector<8x128xf32>
    %c2_i32 = arith.constant 2 : i32
    %83 = arith.index_cast %c2_i32 : i32 to index
    %c0_33 = arith.constant 0 : index
    %c0_34 = arith.constant 0 : index
    %84 = vector.load %arg11[%83, %c0_33, %c0_34] : memref<8x8x512xf32, #tpu.memory_space<vmem>>, vector<1x8x512xf32>
    %85 = vector.shape_cast %84 : vector<1x8x512xf32> to vector<8x512xf32>
    %86 = arith.truncf %81 : vector<8x128xf32> to vector<8x128xbf16>
    %c0_35 = arith.constant 0 : index
    %c0_36 = arith.constant 0 : index
    %87 = vector.load %arg4[%c0_35, %c0_36] : memref<128x512xbf16, #tpu.memory_space<vmem>>, vector<128x512xbf16>
    %cst_37 = arith.constant dense<0.000000e+00> : vector<8x512xf32>
    %88 = tpu.matmul %86, %87, %cst_37 {dimension_numbers = #tpu.dot_dimension_numbers<[1], [0], [0], [1], [0, 0, 1, 1], [], []>} : vector<8x128xbf16>, vector<128x512xbf16>, vector<8x512xf32> -> vector<8x512xf32>
    %89 = arith.addf %85, %88 : vector<8x512xf32>
    %90 = arith.truncf %89 : vector<8x512xf32> to vector<8x512xbf16>
    %91 = vector.extract_strided_slice %90 {offsets = [0, 0], sizes = [8, 384], strides = [1, 1]} : vector<8x512xbf16> to vector<8x384xbf16>
    %cst_38 = arith.constant 5.000000e-01 : bf16
    %92 = vector.broadcast %cst_38 : bf16 to vector<8x384xbf16>
    %93 = arith.mulf %92, %91 : vector<8x384xbf16>
    %94 = math.tanh %93 : vector<8x384xbf16>
    %cst_39 = arith.constant 1.000000e+00 : bf16
    %95 = vector.broadcast %cst_39 : bf16 to vector<8x384xbf16>
    %96 = arith.addf %94, %95 : vector<8x384xbf16>
    %cst_40 = arith.constant 5.000000e-01 : bf16
    %97 = vector.broadcast %cst_40 : bf16 to vector<8x384xbf16>
    %98 = arith.mulf %97, %96 : vector<8x384xbf16>
    %99 = vector.extract_strided_slice %90 {offsets = [0, 384], sizes = [8, 128], strides = [1, 1]} : vector<8x512xbf16> to vector<8x128xbf16>
    %100 = math.tanh %99 : vector<8x128xbf16>
    %101 = arith.extf %100 : vector<8x128xbf16> to vector<8x128xf32>
    %102 = vector.extract_strided_slice %98 {offsets = [0, 0], sizes = [8, 128], strides = [1, 1]} : vector<8x384xbf16> to vector<8x128xbf16>
    %103 = arith.extf %102 : vector<8x128xbf16> to vector<8x128xf32>
    %104 = vector.extract_strided_slice %98 {offsets = [0, 128], sizes = [8, 128], strides = [1, 1]} : vector<8x384xbf16> to vector<8x128xbf16>
    %105 = arith.extf %104 : vector<8x128xbf16> to vector<8x128xf32>
    %106 = vector.extract_strided_slice %98 {offsets = [0, 256], sizes = [8, 128], strides = [1, 1]} : vector<8x384xbf16> to vector<8x128xbf16>
    %107 = arith.extf %106 : vector<8x128xbf16> to vector<8x128xf32>
    %108 = arith.mulf %105, %82 : vector<8x128xf32>
    %109 = arith.mulf %103, %101 : vector<8x128xf32>
    %110 = arith.addf %108, %109 : vector<8x128xf32>
    %111 = math.tanh %110 : vector<8x128xf32>
    %112 = arith.mulf %107, %111 : vector<8x128xf32>
    %113 = arith.addi %12, %c2_i32 : i32
    %c8_i32_41 = arith.constant 8 : i32
    %114 = arith.cmpi slt, %113, %c8_i32_41 : i32
    %115 = arith.select %114, %112, %81 : vector<8x128xf32>
    %116 = arith.select %114, %110, %82 : vector<8x128xf32>
    %c3_i32 = arith.constant 3 : i32
    %117 = arith.index_cast %c3_i32 : i32 to index
    %c0_42 = arith.constant 0 : index
    %c0_43 = arith.constant 0 : index
    %118 = vector.load %arg11[%117, %c0_42, %c0_43] : memref<8x8x512xf32, #tpu.memory_space<vmem>>, vector<1x8x512xf32>
    %119 = vector.shape_cast %118 : vector<1x8x512xf32> to vector<8x512xf32>
    %120 = arith.truncf %115 : vector<8x128xf32> to vector<8x128xbf16>
    %c0_44 = arith.constant 0 : index
    %c0_45 = arith.constant 0 : index
    %121 = vector.load %arg4[%c0_44, %c0_45] : memref<128x512xbf16, #tpu.memory_space<vmem>>, vector<128x512xbf16>
    %cst_46 = arith.constant dense<0.000000e+00> : vector<8x512xf32>
    %122 = tpu.matmul %120, %121, %cst_46 {dimension_numbers = #tpu.dot_dimension_numbers<[1], [0], [0], [1], [0, 0, 1, 1], [], []>} : vector<8x128xbf16>, vector<128x512xbf16>, vector<8x512xf32> -> vector<8x512xf32>
    %123 = arith.addf %119, %122 : vector<8x512xf32>
    %124 = arith.truncf %123 : vector<8x512xf32> to vector<8x512xbf16>
    %125 = vector.extract_strided_slice %124 {offsets = [0, 0], sizes = [8, 384], strides = [1, 1]} : vector<8x512xbf16> to vector<8x384xbf16>
    %cst_47 = arith.constant 5.000000e-01 : bf16
    %126 = vector.broadcast %cst_47 : bf16 to vector<8x384xbf16>
    %127 = arith.mulf %126, %125 : vector<8x384xbf16>
    %128 = math.tanh %127 : vector<8x384xbf16>
    %cst_48 = arith.constant 1.000000e+00 : bf16
    %129 = vector.broadcast %cst_48 : bf16 to vector<8x384xbf16>
    %130 = arith.addf %128, %129 : vector<8x384xbf16>
    %cst_49 = arith.constant 5.000000e-01 : bf16
    %131 = vector.broadcast %cst_49 : bf16 to vector<8x384xbf16>
    %132 = arith.mulf %131, %130 : vector<8x384xbf16>
    %133 = vector.extract_strided_slice %124 {offsets = [0, 384], sizes = [8, 128], strides = [1, 1]} : vector<8x512xbf16> to vector<8x128xbf16>
    %134 = math.tanh %133 : vector<8x128xbf16>
    %135 = arith.extf %134 : vector<8x128xbf16> to vector<8x128xf32>
    %136 = vector.extract_strided_slice %132 {offsets = [0, 0], sizes = [8, 128], strides = [1, 1]} : vector<8x384xbf16> to vector<8x128xbf16>
    %137 = arith.extf %136 : vector<8x128xbf16> to vector<8x128xf32>
    %138 = vector.extract_strided_slice %132 {offsets = [0, 128], sizes = [8, 128], strides = [1, 1]} : vector<8x384xbf16> to vector<8x128xbf16>
    %139 = arith.extf %138 : vector<8x128xbf16> to vector<8x128xf32>
    %140 = vector.extract_strided_slice %132 {offsets = [0, 256], sizes = [8, 128], strides = [1, 1]} : vector<8x384xbf16> to vector<8x128xbf16>
    %141 = arith.extf %140 : vector<8x128xbf16> to vector<8x128xf32>
    %142 = arith.mulf %139, %116 : vector<8x128xf32>
    %143 = arith.mulf %137, %135 : vector<8x128xf32>
    %144 = arith.addf %142, %143 : vector<8x128xf32>
    %145 = math.tanh %144 : vector<8x128xf32>
    %146 = arith.mulf %141, %145 : vector<8x128xf32>
    %147 = arith.addi %12, %c3_i32 : i32
    %c8_i32_50 = arith.constant 8 : i32
    %148 = arith.cmpi slt, %147, %c8_i32_50 : i32
    %149 = arith.select %148, %146, %115 : vector<8x128xf32>
    %150 = arith.select %148, %144, %116 : vector<8x128xf32>
    %c4_i32 = arith.constant 4 : i32
    %151 = arith.index_cast %c4_i32 : i32 to index
    %c0_51 = arith.constant 0 : index
    %c0_52 = arith.constant 0 : index
    %152 = vector.load %arg11[%151, %c0_51, %c0_52] : memref<8x8x512xf32, #tpu.memory_space<vmem>>, vector<1x8x512xf32>
    %153 = vector.shape_cast %152 : vector<1x8x512xf32> to vector<8x512xf32>
    %154 = arith.truncf %149 : vector<8x128xf32> to vector<8x128xbf16>
    %c0_53 = arith.constant 0 : index
    %c0_54 = arith.constant 0 : index
    %155 = vector.load %arg4[%c0_53, %c0_54] : memref<128x512xbf16, #tpu.memory_space<vmem>>, vector<128x512xbf16>
    %cst_55 = arith.constant dense<0.000000e+00> : vector<8x512xf32>
    %156 = tpu.matmul %154, %155, %cst_55 {dimension_numbers = #tpu.dot_dimension_numbers<[1], [0], [0], [1], [0, 0, 1, 1], [], []>} : vector<8x128xbf16>, vector<128x512xbf16>, vector<8x512xf32> -> vector<8x512xf32>
    %157 = arith.addf %153, %156 : vector<8x512xf32>
    %158 = arith.truncf %157 : vector<8x512xf32> to vector<8x512xbf16>
    %159 = vector.extract_strided_slice %158 {offsets = [0, 0], sizes = [8, 384], strides = [1, 1]} : vector<8x512xbf16> to vector<8x384xbf16>
    %cst_56 = arith.constant 5.000000e-01 : bf16
    %160 = vector.broadcast %cst_56 : bf16 to vector<8x384xbf16>
    %161 = arith.mulf %160, %159 : vector<8x384xbf16>
    %162 = math.tanh %161 : vector<8x384xbf16>
    %cst_57 = arith.constant 1.000000e+00 : bf16
    %163 = vector.broadcast %cst_57 : bf16 to vector<8x384xbf16>
    %164 = arith.addf %162, %163 : vector<8x384xbf16>
    %cst_58 = arith.constant 5.000000e-01 : bf16
    %165 = vector.broadcast %cst_58 : bf16 to vector<8x384xbf16>
    %166 = arith.mulf %165, %164 : vector<8x384xbf16>
    %167 = vector.extract_strided_slice %158 {offsets = [0, 384], sizes = [8, 128], strides = [1, 1]} : vector<8x512xbf16> to vector<8x128xbf16>
    %168 = math.tanh %167 : vector<8x128xbf16>
    %169 = arith.extf %168 : vector<8x128xbf16> to vector<8x128xf32>
    %170 = vector.extract_strided_slice %166 {offsets = [0, 0], sizes = [8, 128], strides = [1, 1]} : vector<8x384xbf16> to vector<8x128xbf16>
    %171 = arith.extf %170 : vector<8x128xbf16> to vector<8x128xf32>
    %172 = vector.extract_strided_slice %166 {offsets = [0, 128], sizes = [8, 128], strides = [1, 1]} : vector<8x384xbf16> to vector<8x128xbf16>
    %173 = arith.extf %172 : vector<8x128xbf16> to vector<8x128xf32>
    %174 = vector.extract_strided_slice %166 {offsets = [0, 256], sizes = [8, 128], strides = [1, 1]} : vector<8x384xbf16> to vector<8x128xbf16>
    %175 = arith.extf %174 : vector<8x128xbf16> to vector<8x128xf32>
    %176 = arith.mulf %173, %150 : vector<8x128xf32>
    %177 = arith.mulf %171, %169 : vector<8x128xf32>
    %178 = arith.addf %176, %177 : vector<8x128xf32>
    %179 = math.tanh %178 : vector<8x128xf32>
    %180 = arith.mulf %175, %179 : vector<8x128xf32>
    %181 = arith.addi %12, %c4_i32 : i32
    %c8_i32_59 = arith.constant 8 : i32
    %182 = arith.cmpi slt, %181, %c8_i32_59 : i32
    %183 = arith.select %182, %180, %149 : vector<8x128xf32>
    %184 = arith.select %182, %178, %150 : vector<8x128xf32>
    %c5_i32 = arith.constant 5 : i32
    %185 = arith.index_cast %c5_i32 : i32 to index
    %c0_60 = arith.constant 0 : index
    %c0_61 = arith.constant 0 : index
    %186 = vector.load %arg11[%185, %c0_60, %c0_61] : memref<8x8x512xf32, #tpu.memory_space<vmem>>, vector<1x8x512xf32>
    %187 = vector.shape_cast %186 : vector<1x8x512xf32> to vector<8x512xf32>
    %188 = arith.truncf %183 : vector<8x128xf32> to vector<8x128xbf16>
    %c0_62 = arith.constant 0 : index
    %c0_63 = arith.constant 0 : index
    %189 = vector.load %arg4[%c0_62, %c0_63] : memref<128x512xbf16, #tpu.memory_space<vmem>>, vector<128x512xbf16>
    %cst_64 = arith.constant dense<0.000000e+00> : vector<8x512xf32>
    %190 = tpu.matmul %188, %189, %cst_64 {dimension_numbers = #tpu.dot_dimension_numbers<[1], [0], [0], [1], [0, 0, 1, 1], [], []>} : vector<8x128xbf16>, vector<128x512xbf16>, vector<8x512xf32> -> vector<8x512xf32>
    %191 = arith.addf %187, %190 : vector<8x512xf32>
    %192 = arith.truncf %191 : vector<8x512xf32> to vector<8x512xbf16>
    %193 = vector.extract_strided_slice %192 {offsets = [0, 0], sizes = [8, 384], strides = [1, 1]} : vector<8x512xbf16> to vector<8x384xbf16>
    %cst_65 = arith.constant 5.000000e-01 : bf16
    %194 = vector.broadcast %cst_65 : bf16 to vector<8x384xbf16>
    %195 = arith.mulf %194, %193 : vector<8x384xbf16>
    %196 = math.tanh %195 : vector<8x384xbf16>
    %cst_66 = arith.constant 1.000000e+00 : bf16
    %197 = vector.broadcast %cst_66 : bf16 to vector<8x384xbf16>
    %198 = arith.addf %196, %197 : vector<8x384xbf16>
    %cst_67 = arith.constant 5.000000e-01 : bf16
    %199 = vector.broadcast %cst_67 : bf16 to vector<8x384xbf16>
    %200 = arith.mulf %199, %198 : vector<8x384xbf16>
    %201 = vector.extract_strided_slice %192 {offsets = [0, 384], sizes = [8, 128], strides = [1, 1]} : vector<8x512xbf16> to vector<8x128xbf16>
    %202 = math.tanh %201 : vector<8x128xbf16>
    %203 = arith.extf %202 : vector<8x128xbf16> to vector<8x128xf32>
    %204 = vector.extract_strided_slice %200 {offsets = [0, 0], sizes = [8, 128], strides = [1, 1]} : vector<8x384xbf16> to vector<8x128xbf16>
    %205 = arith.extf %204 : vector<8x128xbf16> to vector<8x128xf32>
    %206 = vector.extract_strided_slice %200 {offsets = [0, 128], sizes = [8, 128], strides = [1, 1]} : vector<8x384xbf16> to vector<8x128xbf16>
    %207 = arith.extf %206 : vector<8x128xbf16> to vector<8x128xf32>
    %208 = vector.extract_strided_slice %200 {offsets = [0, 256], sizes = [8, 128], strides = [1, 1]} : vector<8x384xbf16> to vector<8x128xbf16>
    %209 = arith.extf %208 : vector<8x128xbf16> to vector<8x128xf32>
    %210 = arith.mulf %207, %184 : vector<8x128xf32>
    %211 = arith.mulf %205, %203 : vector<8x128xf32>
    %212 = arith.addf %210, %211 : vector<8x128xf32>
    %213 = math.tanh %212 : vector<8x128xf32>
    %214 = arith.mulf %209, %213 : vector<8x128xf32>
    %215 = arith.addi %12, %c5_i32 : i32
    %c8_i32_68 = arith.constant 8 : i32
    %216 = arith.cmpi slt, %215, %c8_i32_68 : i32
    %217 = arith.select %216, %214, %183 : vector<8x128xf32>
    %218 = arith.select %216, %212, %184 : vector<8x128xf32>
    %c6_i32 = arith.constant 6 : i32
    %219 = arith.index_cast %c6_i32 : i32 to index
    %c0_69 = arith.constant 0 : index
    %c0_70 = arith.constant 0 : index
    %220 = vector.load %arg11[%219, %c0_69, %c0_70] : memref<8x8x512xf32, #tpu.memory_space<vmem>>, vector<1x8x512xf32>
    %221 = vector.shape_cast %220 : vector<1x8x512xf32> to vector<8x512xf32>
    %222 = arith.truncf %217 : vector<8x128xf32> to vector<8x128xbf16>
    %c0_71 = arith.constant 0 : index
    %c0_72 = arith.constant 0 : index
    %223 = vector.load %arg4[%c0_71, %c0_72] : memref<128x512xbf16, #tpu.memory_space<vmem>>, vector<128x512xbf16>
    %cst_73 = arith.constant dense<0.000000e+00> : vector<8x512xf32>
    %224 = tpu.matmul %222, %223, %cst_73 {dimension_numbers = #tpu.dot_dimension_numbers<[1], [0], [0], [1], [0, 0, 1, 1], [], []>} : vector<8x128xbf16>, vector<128x512xbf16>, vector<8x512xf32> -> vector<8x512xf32>
    %225 = arith.addf %221, %224 : vector<8x512xf32>
    %226 = arith.truncf %225 : vector<8x512xf32> to vector<8x512xbf16>
    %227 = vector.extract_strided_slice %226 {offsets = [0, 0], sizes = [8, 384], strides = [1, 1]} : vector<8x512xbf16> to vector<8x384xbf16>
    %cst_74 = arith.constant 5.000000e-01 : bf16
    %228 = vector.broadcast %cst_74 : bf16 to vector<8x384xbf16>
    %229 = arith.mulf %228, %227 : vector<8x384xbf16>
    %230 = math.tanh %229 : vector<8x384xbf16>
    %cst_75 = arith.constant 1.000000e+00 : bf16
    %231 = vector.broadcast %cst_75 : bf16 to vector<8x384xbf16>
    %232 = arith.addf %230, %231 : vector<8x384xbf16>
    %cst_76 = arith.constant 5.000000e-01 : bf16
    %233 = vector.broadcast %cst_76 : bf16 to vector<8x384xbf16>
    %234 = arith.mulf %233, %232 : vector<8x384xbf16>
    %235 = vector.extract_strided_slice %226 {offsets = [0, 384], sizes = [8, 128], strides = [1, 1]} : vector<8x512xbf16> to vector<8x128xbf16>
    %236 = math.tanh %235 : vector<8x128xbf16>
    %237 = arith.extf %236 : vector<8x128xbf16> to vector<8x128xf32>
    %238 = vector.extract_strided_slice %234 {offsets = [0, 0], sizes = [8, 128], strides = [1, 1]} : vector<8x384xbf16> to vector<8x128xbf16>
    %239 = arith.extf %238 : vector<8x128xbf16> to vector<8x128xf32>
    %240 = vector.extract_strided_slice %234 {offsets = [0, 128], sizes = [8, 128], strides = [1, 1]} : vector<8x384xbf16> to vector<8x128xbf16>
    %241 = arith.extf %240 : vector<8x128xbf16> to vector<8x128xf32>
    %242 = vector.extract_strided_slice %234 {offsets = [0, 256], sizes = [8, 128], strides = [1, 1]} : vector<8x384xbf16> to vector<8x128xbf16>
    %243 = arith.extf %242 : vector<8x128xbf16> to vector<8x128xf32>
    %244 = arith.mulf %241, %218 : vector<8x128xf32>
    %245 = arith.mulf %239, %237 : vector<8x128xf32>
    %246 = arith.addf %244, %245 : vector<8x128xf32>
    %247 = math.tanh %246 : vector<8x128xf32>
    %248 = arith.mulf %243, %247 : vector<8x128xf32>
    %249 = arith.addi %12, %c6_i32 : i32
    %c8_i32_77 = arith.constant 8 : i32
    %250 = arith.cmpi slt, %249, %c8_i32_77 : i32
    %251 = arith.select %250, %248, %217 : vector<8x128xf32>
    %252 = arith.select %250, %246, %218 : vector<8x128xf32>
    %c7_i32 = arith.constant 7 : i32
    %253 = arith.index_cast %c7_i32 : i32 to index
    %c0_78 = arith.constant 0 : index
    %c0_79 = arith.constant 0 : index
    %254 = vector.load %arg11[%253, %c0_78, %c0_79] : memref<8x8x512xf32, #tpu.memory_space<vmem>>, vector<1x8x512xf32>
    %255 = vector.shape_cast %254 : vector<1x8x512xf32> to vector<8x512xf32>
    %256 = arith.truncf %251 : vector<8x128xf32> to vector<8x128xbf16>
    %c0_80 = arith.constant 0 : index
    %c0_81 = arith.constant 0 : index
    %257 = vector.load %arg4[%c0_80, %c0_81] : memref<128x512xbf16, #tpu.memory_space<vmem>>, vector<128x512xbf16>
    %cst_82 = arith.constant dense<0.000000e+00> : vector<8x512xf32>
    %258 = tpu.matmul %256, %257, %cst_82 {dimension_numbers = #tpu.dot_dimension_numbers<[1], [0], [0], [1], [0, 0, 1, 1], [], []>} : vector<8x128xbf16>, vector<128x512xbf16>, vector<8x512xf32> -> vector<8x512xf32>
    %259 = arith.addf %255, %258 : vector<8x512xf32>
    %260 = arith.truncf %259 : vector<8x512xf32> to vector<8x512xbf16>
    %261 = vector.extract_strided_slice %260 {offsets = [0, 0], sizes = [8, 384], strides = [1, 1]} : vector<8x512xbf16> to vector<8x384xbf16>
    %cst_83 = arith.constant 5.000000e-01 : bf16
    %262 = vector.broadcast %cst_83 : bf16 to vector<8x384xbf16>
    %263 = arith.mulf %262, %261 : vector<8x384xbf16>
    %264 = math.tanh %263 : vector<8x384xbf16>
    %cst_84 = arith.constant 1.000000e+00 : bf16
    %265 = vector.broadcast %cst_84 : bf16 to vector<8x384xbf16>
    %266 = arith.addf %264, %265 : vector<8x384xbf16>
    %cst_85 = arith.constant 5.000000e-01 : bf16
    %267 = vector.broadcast %cst_85 : bf16 to vector<8x384xbf16>
    %268 = arith.mulf %267, %266 : vector<8x384xbf16>
    %269 = vector.extract_strided_slice %260 {offsets = [0, 384], sizes = [8, 128], strides = [1, 1]} : vector<8x512xbf16> to vector<8x128xbf16>
    %270 = math.tanh %269 : vector<8x128xbf16>
    %271 = arith.extf %270 : vector<8x128xbf16> to vector<8x128xf32>
    %272 = vector.extract_strided_slice %268 {offsets = [0, 0], sizes = [8, 128], strides = [1, 1]} : vector<8x384xbf16> to vector<8x128xbf16>
    %273 = arith.extf %272 : vector<8x128xbf16> to vector<8x128xf32>
    %274 = vector.extract_strided_slice %268 {offsets = [0, 128], sizes = [8, 128], strides = [1, 1]} : vector<8x384xbf16> to vector<8x128xbf16>
    %275 = arith.extf %274 : vector<8x128xbf16> to vector<8x128xf32>
    %276 = vector.extract_strided_slice %268 {offsets = [0, 256], sizes = [8, 128], strides = [1, 1]} : vector<8x384xbf16> to vector<8x128xbf16>
    %277 = arith.extf %276 : vector<8x128xbf16> to vector<8x128xf32>
    %278 = arith.mulf %275, %252 : vector<8x128xf32>
    %279 = arith.mulf %273, %271 : vector<8x128xf32>
    %280 = arith.addf %278, %279 : vector<8x128xf32>
    %281 = math.tanh %280 : vector<8x128xf32>
    %282 = arith.mulf %277, %281 : vector<8x128xf32>
    %283 = arith.addi %12, %c7_i32 : i32
    %c8_i32_86 = arith.constant 8 : i32
    %284 = arith.cmpi slt, %283, %c8_i32_86 : i32
    %285 = arith.select %284, %282, %251 : vector<8x128xf32>
    %286 = arith.select %284, %280, %252 : vector<8x128xf32>
    %c8_i32_87 = arith.constant 8 : i32
    %c0_88 = arith.constant 0 : index
    %c0_89 = arith.constant 0 : index
    %287 = vector.load %arg9[%c0_88, %c0_89] : memref<8x128xf32, #tpu.memory_space<vmem>>, vector<8x128xf32>
    tpu.vector_store %arg9[%c0_88, %c0_89], %285 {strides = array<i32>} : memref<8x128xf32, #tpu.memory_space<vmem>>, vector<8x128xf32>,
    %c0_90 = arith.constant 0 : index
    %c0_91 = arith.constant 0 : index
    %288 = vector.load %arg10[%c0_90, %c0_91] : memref<8x128xf32, #tpu.memory_space<vmem>>, vector<8x128xf32>
    tpu.vector_store %arg10[%c0_90, %c0_91], %286 {strides = array<i32>} : memref<8x128xf32, #tpu.memory_space<vmem>>, vector<8x128xf32>,
    %c0_i32_92 = arith.constant 0 : i32
    %289 = arith.cmpi eq, %arg1, %c0_i32_92 : i32
    %290 = arith.extui %289 : i1 to i32
    %c0_i32_93 = arith.constant 0 : i32
    %291 = arith.cmpi ne, %290, %c0_i32_93 : i32
    scf.if %291 {
      %292 = arith.truncf %285 : vector<8x128xf32> to vector<8x128xbf16>
      %c0_94 = arith.constant 0 : index
      %c0_95 = arith.constant 0 : index
      %293 = vector.load %arg6[%c0_94, %c0_95] : memref<128x128xbf16, #tpu.memory_space<vmem>>, vector<128x128xbf16>
      %cst_96 = arith.constant dense<0.000000e+00> : vector<8x128xf32>
      %294 = tpu.matmul %292, %293, %cst_96 {dimension_numbers = #tpu.dot_dimension_numbers<[1], [0], [0], [1], [0, 0, 1, 1], [], []>} : vector<8x128xbf16>, vector<128x128xbf16>, vector<8x128xf32> -> vector<8x128xf32>
      %c0_97 = arith.constant 0 : index
      %c0_98 = arith.constant 0 : index
      %295 = vector.load %arg7[%c0_97, %c0_98] : memref<1x128xf32, #tpu.memory_space<vmem>>, vector<1x128xf32>
      %296 = vector.broadcast %295 : vector<1x128xf32> to vector<8x128xf32>
      %297 = arith.addf %294, %296 : vector<8x128xf32>
      %c0_99 = arith.constant 0 : index
      %c0_100 = arith.constant 0 : index
      %298 = vector.load %arg8[%c0_99, %c0_100] : memref<8x128xf32, #tpu.memory_space<vmem>>, vector<8x128xf32>
      tpu.vector_store %arg8[%c0_99, %c0_100], %297 {strides = array<i32>} : memref<8x128xf32, #tpu.memory_space<vmem>>, vector<8x128xf32>,
    } else {
    }
    return
  }
  func.func @transform_0(%arg0: i32, %arg1: i32) -> (i32, i32, i32) {
    %c0_i32 = arith.constant 0 : i32
    %c0_i32_0 = arith.constant 0 : i32
    return %arg1, %arg0, %c0_i32 : i32, i32, i32
  }
  func.func @transform_1(%arg0: i32, %arg1: i32) -> (i32, i32) {
    %c0_i32 = arith.constant 0 : i32
    %c0_i32_0 = arith.constant 0 : i32
    %c0_i32_1 = arith.constant 0 : i32
    return %c0_i32, %c0_i32_0 : i32, i32
  }
  func.func @transform_2(%arg0: i32, %arg1: i32) -> (i32, i32) {
    %c0_i32 = arith.constant 0 : i32
    %c0_i32_0 = arith.constant 0 : i32
    %c0_i32_1 = arith.constant 0 : i32
    return %c0_i32, %c0_i32_0 : i32, i32
  }
  func.func @transform_3(%arg0: i32, %arg1: i32) -> (i32, i32) {
    %c0_i32 = arith.constant 0 : i32
    %c0_i32_0 = arith.constant 0 : i32
    %c0_i32_1 = arith.constant 0 : i32
    return %c0_i32, %c0_i32_0 : i32, i32
  }
  func.func @transform_4(%arg0: i32, %arg1: i32) -> (i32, i32) {
    %c0_i32 = arith.constant 0 : i32
    %c0_i32_0 = arith.constant 0 : i32
    %c0_i32_1 = arith.constant 0 : i32
    return %c0_i32, %c0_i32_0 : i32, i32
  }
  func.func @transform_5(%arg0: i32, %arg1: i32) -> (i32, i32) {
    %c0_i32 = arith.constant 0 : i32
    %c0_i32_0 = arith.constant 0 : i32
    %c0_i32_1 = arith.constant 0 : i32
    return %c0_i32, %c0_i32_0 : i32, i32
  }
  func.func @transform_6(%arg0: i32, %arg1: i32) -> (i32, i32) {
    %c0_i32 = arith.constant 0 : i32
    %c0_i32_0 = arith.constant 0 : i32
    return %arg0, %c0_i32 : i32, i32
  }
}

</mosaic_0001>

<bundles_post_ra>
// kernel: tpu_custom_call.1
= control target key start
LH: loop header
LB: loop body
LE: loop exit
PB: predicated region body
PF: predicated region fallthrough
CT: control target
= control target key end

     0   :  { %11 = vsyncpa [#allocation6], 0  ;;  %s2763_s0 = inlined_call_operand.hbm [shape: bf16[8,8,16], index: 0, kind: input, shape index: {}]   ;;  %s2764_s1 = inlined_call_operand.hbm [shape: bf16[16,512], index: 1, kind: input, shape index: {}]   ;;  %s2765_s2 = inlined_call_operand.hbm [shape: bf16[128,512], index: 2, kind: input, shape index: {}]   ;;  %s2766_s3 = inlined_call_operand.vmem [shape: f32[1,512], index: 3, kind: input, shape index: {}]   ;;  %s2767_s4 = inlined_call_operand.hbm [shape: bf16[128,128], index: 4, kind: input, shape index: {}]   ;;  %s2768_s5 = inlined_call_operand.vmem [shape: f32[1,128], index: 5, kind: input, shape index: {}]   ;;  %s2769_s6 = inlined_call_operand.hbm [shape: f32[8,128], index: 6, kind: output, shape index: {}]  }
   0x1   :  { %12 = vsyncpa [#allocation9], 0 }
   0x2   :  { %13 = vsyncpa [#allocation12], 0 }
   0x3   :  { %14 = vsyncpa [#allocation7], 0  ;;  %s2076_s21 = smov [#allocation8]   ;;  %s1958_s25 = scalar_lea.hbm %s2764_s1, 512 }
   0x4   :  { %s32_s22 = sshll.u32 %s2076_s21, 4  ;;  %p1959_p0 = scmp.ne.s32.totalorder %s2764_s1, %s1958_s25  ;;  %s33_s22 = int_to_ptr.vmem [resolvable:$true] %s32_s22 }
   0x5   :  { %p1962_p1 = scmp.lt.u32.totalorder %s1958_s25, %s2764_s1 }
   0x7   :  { %p1964_p2 = pnand %p1962_p1, %p1959_p0 }
   0x9   :  { %1967 = shalt.err (!%p1964_p2)
}
   0xa   :  { %s1968_s30 = scalar_lea.vmem %s33_s22, 512  ;;  %p1973_p4 = scmp.lt.s32.totalorder %s33_s22, %s33_s22 }
   0xb   :  { %p1969_p3 = scmp.ne.s32.totalorder %s33_s22, %s1968_s30  ;;  %p1974_p5 = scmp.lt.s32.totalorder %s1968_s30, %s1968_s30 }
   0xd   :  { %p1975_p6 = por %p1974_p5, %p1973_p4 }
   0xf   :  { %p1976_p7 = pnand %p1975_p6, %p1969_p3 }
  0x11   :  { %1979 = shalt.err (!%p1976_p7)
}
  0x12   :  { %s2077_s7 = smov 256   ;;  %s2078_s8 = smov 16  }
  0x13   :  { %38 = dma.hbm_to_vmem [thread:$0]  %s2764_s1, 512, %s33_s22, [#allocation9], %s2077_s7, %s2077_s7, %s2078_s8  }
  0x14   :  { %s2079_s11 = smov [#allocation5]   ;;  %s1980_s15 = scalar_lea.hbm %s2763_s0, 512 }
  0x15   :  { %s20_s12 = sshll.u32 %s2079_s11, 4  ;;  %p1981_p8 = scmp.ne.s32.totalorder %s2763_s0, %s1980_s15  ;;  %s21_s12 = int_to_ptr.vmem [resolvable:$true] %s20_s12 }
  0x16   :  { %p1984_p9 = scmp.lt.u32.totalorder %s1980_s15, %s2763_s0 }
  0x18   :  { %p1986_p10 = pnand %p1984_p9, %p1981_p8 }
  0x1a   :  { %1989 = shalt.err (!%p1986_p10)
}
  0x1b   :  { %s1990_s20 = scalar_lea.vmem %s21_s12, 512  ;;  %p1995_p12 = scmp.lt.s32.totalorder %s21_s12, %s21_s12 }
  0x1c   :  { %p1991_p11 = scmp.ne.s32.totalorder %s21_s12, %s1990_s20  ;;  %p1996_p13 = scmp.lt.s32.totalorder %s1990_s20, %s1990_s20 }
  0x1e   :  { %p1997_p0 = por %p1996_p13, %p1995_p12 }
  0x20   :  { %p1998_p1 = pnand %p1997_p0, %p1991_p11 }
  0x22   :  { %2001 = shalt.err (!%p1998_p1)
}
  0x23   :  { %s2080_s1 = smov 64   ;;  %s2081_s21 = smov 4  }
  0x24   :  { %26 = dma.hbm_to_vmem [thread:$0]  %s2763_s0, 512, %s21_s12, [#allocation6], %s2080_s1, %s2080_s1, %s2081_s21  }
  0x25   :  { %s2082_s24 = smov [#allocation10]   ;;  %s2083_s26 = smov [#allocation11]  }
  0x26   :  { %s44_s25 = sshll.u32 %s2082_s24, 4  ;;  %s58_s27 = sshll.u32 %s2083_s26, 4  ;;  %s45_s25 = int_to_ptr.vmem [resolvable:$true] %s44_s25  ;;  %s2154_s27 = int_to_ptr.vmem [resolvable:$true] %s58_s27 }
  0x27   :  { %s2002_s30 = scalar_lea.hbm %s2765_s2, 4096 }
  0x28   :  { %p2003_p2 = scmp.ne.s32.totalorder %s2765_s2, %s2002_s30  ;;  %p2006_p3 = scmp.lt.u32.totalorder %s2002_s30, %s2765_s2 }
  0x2a   :  { %p2008_p4 = pnand %p2006_p3, %p2003_p2 }
  0x2c   :  { %2011 = shalt.err (!%p2008_p4)
}
  0x2d   :  { %s2012_s0 = scalar_lea.vmem %s45_s25, 4096  ;;  %p2017_p6 = scmp.lt.s32.totalorder %s45_s25, %s45_s25 }
  0x2e   :  { %p2013_p5 = scmp.ne.s32.totalorder %s45_s25, %s2012_s0  ;;  %p2018_p7 = scmp.lt.s32.totalorder %s2012_s0, %s2012_s0 }
  0x30   :  { %p2019_p8 = por %p2018_p7, %p2017_p6 }
  0x32   :  { %p2020_p9 = pnand %p2019_p8, %p2013_p5 }
  0x34   :  { %2023 = shalt.err (!%p2020_p9)
}
  0x35   :  { %50 = dma.hbm_to_vmem [thread:$0]  %s2765_s2, 4096, %s45_s25, [#allocation9], %s2077_s7, %s2077_s7, %s2078_s8  }
  0x36   :  { %s2024_s17 = scalar_lea.hbm %s2767_s4, 1024 }
  0x37   :  { %p2025_p10 = scmp.ne.s32.totalorder %s2767_s4, %s2024_s17  ;;  %p2028_p11 = scmp.lt.u32.totalorder %s2024_s17, %s2767_s4 }
  0x39   :  { %p2030_p12 = pnand %p2028_p11, %p2025_p10 }
  0x3b   :  { %2033 = shalt.err (!%p2030_p12)
}
  0x3c   :  { %s2034_s23 = scalar_lea.vmem %s2154_s27, 1024  ;;  %p2039_p0 = scmp.lt.s32.totalorder %s2154_s27, %s2154_s27 }
  0x3d   :  { %p2035_p13 = scmp.ne.s32.totalorder %s2154_s27, %s2034_s23  ;;  %p2040_p1 = scmp.lt.s32.totalorder %s2034_s23, %s2034_s23 }
  0x3f   :  { %p2041_p2 = por %p2040_p1, %p2039_p0 }
  0x41   :  { %p2042_p3 = pnand %p2041_p2, %p2035_p13 }
  0x43   :  { %2045 = shalt.err (!%p2042_p3)
}
  0x44   :  { %64 = dma.hbm_to_vmem [thread:$0]  %s2767_s4, 1024, %s2154_s27, [#allocation12], %s2080_s1, %s2080_s1, %s2081_s21  }
  0x45   :  { %2068 = dma.done.wait [#allocation6], 512  }
  0x46   :  { %2069 = vsyncadd [#allocation6], 4294966784 }
  0x47   :  { %2070 = dma.done.wait [#allocation9], 4608  }
  0x48   :  { %2071 = vsyncadd [#allocation9], 4294962688 }
  0x49   :  { %2072 = dma.done.wait [#allocation12], 1024  }
  0x4a   :  { %2073 = vsyncadd [#allocation12], 4294966272  ;;  %v2770_v0 = vmov 0   ;;  %v1780_v1 = vld [vmem:[#allocation8 + $0x4] ss:$16 sps:$4 sm:$0xff]   ;;  %vm162_vm0 = vcmask 130048   ;;  %v102_v42 = vlaneseq }
  0x4b   :  { %207 = vmatprep.mubr.bf16.mxu0 %v2770_v0  ;;  %280 = vmatprep.mubr.bf16.mxu1 %v2770_v0  ;;  %v1782_v2 = vld [vmem:[#allocation8 + $0xc] ss:$16 sps:$4 sm:$0xff]   ;;  %v1784_v3 = vld [vmem:[#allocation8] ss:$16 sps:$4 sm:$0xff]   ;;  %v1785_v4 = vld [vmem:[#allocation8 + $0x8] ss:$16 sps:$4 sm:$0xff]  }
  0x4c   :  { %175 = vmatprep.subr.bf16.mxu0 %v1780_v1  ;;  %248 = vmatprep.subr.bf16.mxu1 %v1782_v2  ;;  %v1786_v5 = vld [vmem:[#allocation5] sm:$0xff]   ;;  %v2195_v7 = vld [vmem:[#allocation10 + $0xc] ss:$16 sps:$4 sm:$0xff]   ;;  %v2200_v9 = vld [vmem:[#allocation10 + $0x8] ss:$16 sps:$4 sm:$0xff]   ;;  %v2085_v41 = vmov 0.0|0.0  }
  0x4d   :  { %176 = vmatpush1.bf16.msra.mxu0 %v1784_v3  ;;  %249 = vmatpush1.bf16.msra.mxu1 %v1785_v4  ;;  %v2193_v6 = vld [vmem:[#allocation10 + $0x4] ss:$16 sps:$4 sm:$0xff]   ;;  %v2197_v8 = vld [vmem:[#allocation10] ss:$16 sps:$4 sm:$0xff]   ;;  %v2208_v11 = vld [vmem:[#allocation10 + $0x2c] ss:$16 sps:$4 sm:$0xff]  }
  0x4e   :  { %553 = vmatprep.subr.bf16.mxu0 %v2193_v6  ;;  %v2204_v10 = vld [vmem:[#allocation10 + $0x24] ss:$16 sps:$4 sm:$0xff]   ;;  %594 = vmatprep.subr.bf16.mxu1 %v2195_v7  ;;  %v2210_v12 = vld [vmem:[#allocation10 + $0x20] ss:$16 sps:$4 sm:$0xff]   ;;  %v2212_v13 = vld [vmem:[#allocation10 + $0x28] ss:$16 sps:$4 sm:$0xff]  }
  0x4f   :  { %v1799_v14 = vld [vmem:[#allocation5 + $0x8] sm:$0xff]   ;;  %v2218_v15 = vld [vmem:[#allocation10 + $0x44] ss:$16 sps:$4 sm:$0xff]   ;;  %v2224_v17 = vld [vmem:[#allocation10 + $0x40] ss:$16 sps:$4 sm:$0xff]   ;;  %v103_v43 = vshrl.u32 %v102_v42, 7 }
  0x50   :  { %1689 = vmatmul.mubr.msk.bf16.vlgmr.msra.gmra.mrb[0].mxu0 %vm162_vm0, %v1786_v5  ;;  %1693 = vmatmul.mubr.msk.bf16.vlgmr.msra.gmra.mrb[0].mxu1 %vm162_vm0, %v1786_v5  ;;  %v2221_v16 = vld [vmem:[#allocation10 + $0x4c] ss:$16 sps:$4 sm:$0xff]   ;;  %v2226_v18 = vld [vmem:[#allocation10 + $0x48] ss:$16 sps:$4 sm:$0xff]   ;;  %v2230_v19 = vld [vmem:[#allocation10 + $0x64] ss:$16 sps:$4 sm:$0xff]  }
  0x51   :  { %554 = vmatpush1.bf16.msra.mxu0 %v2197_v8  ;;  %595 = vmatpush1.bf16.msra.mxu1 %v2200_v9  ;;  %v2233_v20 = vld [vmem:[#allocation10 + $0x6c] ss:$16 sps:$4 sm:$0xff]   ;;  %v2237_v21 = vld [vmem:[#allocation10 + $0x60] ss:$16 sps:$4 sm:$0xff]   ;;  %v2240_v22 = vld [vmem:[#allocation10 + $0x68] ss:$16 sps:$4 sm:$0xff]  }
  0x52   :  { %555 = vmatprep.subr.bf16.mxu0 %v2204_v10  ;;  %596 = vmatprep.subr.bf16.mxu1 %v2208_v11  ;;  %v2245_v23 = vld [vmem:[#allocation10 + $0x84] ss:$16 sps:$4 sm:$0xff]   ;;  %v2249_v24 = vld [vmem:[#allocation10 + $0x8c] ss:$16 sps:$4 sm:$0xff]   ;;  %v2252_v26 = vld [vmem:[#allocation10 + $0x80] ss:$16 sps:$4 sm:$0xff]  }
  0x53   :  { %217 = vmatprep.mubr.bf16.mxu0 %v2770_v0  ;;  %290 = vmatprep.mubr.bf16.mxu1 %v2770_v0  ;;  %v1812_v25 = vld [vmem:[#allocation5 + $0x10] sm:$0xff]   ;;  %v2256_v27 = vld [vmem:[#allocation10 + $0x88] ss:$16 sps:$4 sm:$0xff]   ;;  %v2261_v29 = vld [vmem:[#allocation10 + $0xac] ss:$16 sps:$4 sm:$0xff]   ;;  %v112_v44 = vsub.s32 2, %v103_v43 }
  0x54   :  { %v2258_v28 = vld [vmem:[#allocation10 + $0xa4] ss:$16 sps:$4 sm:$0xff]   ;;  %v2266_v30 = vld [vmem:[#allocation10 + $0xa0] ss:$16 sps:$4 sm:$0xff]   ;;  %v2268_v31 = vld [vmem:[#allocation10 + $0xa8] ss:$16 sps:$4 sm:$0xff]  }
  0x55   :  { %556 = vmatpush1.bf16.msra.mxu0 %v2210_v12  ;;  %597 = vmatpush1.bf16.msra.mxu1 %v2212_v13  ;;  %v1825_v32 = vld [vmem:[#allocation5 + $0x18] sm:$0xff]   ;;  %v2273_v33 = vld [vmem:[#allocation10 + $0xc4] ss:$16 sps:$4 sm:$0xff]   ;;  %v2279_v35 = vld [vmem:[#allocation10 + $0xc0] ss:$16 sps:$4 sm:$0xff]   ;;  %v116_v45 = vsub.s32 3, %v103_v43 }
  0x56   :  { %557 = vmatprep.subr.bf16.mxu0 %v2218_v15  ;;  %598 = vmatprep.subr.bf16.mxu1 %v2221_v16  ;;  %v2277_v34 = vld [vmem:[#allocation10 + $0xcc] ss:$16 sps:$4 sm:$0xff]   ;;  %v2281_v36 = vld [vmem:[#allocation10 + $0xc8] ss:$16 sps:$4 sm:$0xff]   ;;  %v2283_v37 = vld [vmem:[#allocation10 + $0xe4] ss:$16 sps:$4 sm:$0xff]  }
  0x57   :  { %v2286_v38 = vld [vmem:[#allocation10 + $0xec] ss:$16 sps:$4 sm:$0xff]   ;;  %v2291_v39 = vld [vmem:[#allocation10 + $0xe0] ss:$16 sps:$4 sm:$0xff]   ;;  %v2299_v40 = vld [vmem:[#allocation10 + $0xe8] ss:$16 sps:$4 sm:$0xff]  }
  0x58   :  { %1690 = vmatmul.mubr.msk.bf16.gmra.mrb[4].mxu0 %vm162_vm0, %v1799_v14  ;;  %1694 = vmatmul.mubr.msk.bf16.gmra.mrb[4].mxu1 %vm162_vm0, %v1799_v14  ;;  %v104_v46 = vsub.s32 0, %v103_v43  ;;  %v100_v47 = vld [vmem:[%s2766_s3] sm:$0xf]  ;;  %v108_v48 = vsub.s32 1, %v103_v43  ;;  %vm2087_vm1 = vmmov 0   ;;  %s2088_s21 = smov [#allocation13]  }
  0x59   :  { %558 = vmatpush1.bf16.msra.mxu0 %v2224_v17  ;;  %227 = vmatprep.mubr.bf16.mxu0 %v2770_v0  ;;  %v2344_v49 = vrot.slane %v100_v47, %v112_v44  ;;  %v2350_v52 = vrot.slane %v100_v47, %v116_v45  ;;  %s1670_s24 = sshll.u32 %s2088_s21, 4  ;;  %s1671_s24 = int_to_ptr.vmem [resolvable:$true] %s1670_s24 }
  0x5a   :  { %599 = vmatpush1.bf16.msra.mxu1 %v2226_v18  ;;  %559 = vmatprep.subr.bf16.mxu0 %v2230_v19  ;;  %v105_v53 = vrot.slane %v100_v47, %v104_v46  ;;  %v109_v56 = vrot.slane %v100_v47, %v108_v48  ;;  %s2046_s25 = scalar_lea.vmem %s1671_s24, 128  ;;  %p2051_p5 = scmp.lt.s32.totalorder %s1671_s24, %s1671_s24 }
  0x5b   :  { %600 = vmatprep.subr.bf16.mxu1 %v2233_v20  ;;  %300 = vmatprep.mubr.bf16.mxu1 %v2770_v0  ;;  %p2047_p4 = scmp.ne.s32.totalorder %s1671_s24, %s2046_s25  ;;  %p2052_p6 = scmp.lt.s32.totalorder %s2046_s25, %s2046_s25 }
  0x5d   :  { %560 = vmatpush1.bf16.msra.mxu0 %v2237_v21  ;;  %p2053_p7 = por %p2052_p6, %p2051_p5 }
  0x5e   :  { %601 = vmatpush1.bf16.msra.mxu1 %v2240_v22  ;;  %561 = vmatprep.subr.bf16.mxu0 %v2245_v23 }
  0x5f   :  { %602 = vmatprep.subr.bf16.mxu1 %v2249_v24  ;;  %p2054_p8 = pnand %p2053_p7, %p2047_p4 }
  0x60   :  { %1691 = vmatmul.mubr.msk.bf16.gmra.mrb[8].mxu0 %vm162_vm0, %v1812_v25  ;;  %1695 = vmatmul.mubr.msk.bf16.gmra.mrb[8].mxu1 %vm162_vm0, %v1812_v25 }
  0x61   :  { %562 = vmatpush1.bf16.msra.mxu0 %v2252_v26  ;;  %237 = vmatprep.mubr.bf16.mxu0 %v2770_v0 }
  0x62   :  { %603 = vmatpush1.bf16.msra.mxu1 %v2256_v27  ;;  %563 = vmatprep.subr.bf16.mxu0 %v2258_v28 }
  0x63   :  { %604 = vmatprep.subr.bf16.mxu1 %v2261_v29  ;;  %310 = vmatprep.mubr.bf16.mxu1 %v2770_v0 }
  0x65   :  { %564 = vmatpush1.bf16.msra.mxu0 %v2266_v30 }
  0x66   :  { %605 = vmatpush1.bf16.msra.mxu1 %v2268_v31  ;;  %565 = vmatprep.subr.bf16.mxu0 %v2273_v33 }
  0x67   :  { %606 = vmatprep.subr.bf16.mxu1 %v2277_v34 }
  0x68   :  { %1692 = vmatmul.mubr.msk.bf16.gmra.mrb[12].mxu0 %vm162_vm0, %v1825_v32  ;;  %1696 = vmatmul.mubr.msk.bf16.gmra.mrb[12].mxu1 %vm162_vm0, %v1825_v32 }
  0x69   :  { %566 = vmatpush1.bf16.msra.mxu0 %v2279_v35  ;;  %585 = vmatprep.mubr.bf16.mxu0 %v2770_v0 }
  0x6a   :  { %607 = vmatpush1.bf16.msra.mxu1 %v2281_v36  ;;  %567 = vmatprep.subr.bf16.mxu0 %v2283_v37 }
  0x6b   :  { %608 = vmatprep.subr.bf16.mxu1 %v2286_v38  ;;  %626 = vmatprep.mubr.bf16.mxu1 %v2770_v0 }
  0x6d   :  { %568 = vmatpush1.bf16.msra.mxu0 %v2291_v39 }
  0x6e   :  { %609 = vmatpush1.bf16.msra.mxu1 %v2299_v40  ;;  %677 = vmatprep.subr.bf16.mxu0 %v2193_v6 }
  0x6f   :  { %718 = vmatprep.subr.bf16.mxu1 %v2195_v7 }
  0x70   :  { %586 = vmatmul.mubr.bf16.vlgmr.msra.gmra.mrb[16].mxu0 %v2085_v41 }
  0x71   :  { %627 = vmatmul.mubr.bf16.vlgmr.msra.gmra.mrb[16].mxu1 %v2085_v41  ;;  %678 = vmatpush1.bf16.msra.mxu0 %v2197_v8 }
  0x72   :  { %719 = vmatpush1.bf16.msra.mxu1 %v2200_v9  ;;  %679 = vmatprep.subr.bf16.mxu0 %v2204_v10 }
  0x73   :  { %720 = vmatprep.subr.bf16.mxu1 %v2208_v11  ;;  %709 = vmatprep.mubr.bf16.mxu0 %v2770_v0 }
  0x74   :  { %750 = vmatprep.mubr.bf16.mxu1 %v2770_v0 }
  0x75   :  { %680 = vmatpush1.bf16.msra.mxu0 %v2210_v12 }
  0x76   :  { %721 = vmatpush1.bf16.msra.mxu1 %v2212_v13  ;;  %681 = vmatprep.subr.bf16.mxu0 %v2218_v15 }
  0x77   :  { %722 = vmatprep.subr.bf16.mxu1 %v2221_v16 }
  0x79   :  { %682 = vmatpush1.bf16.msra.mxu0 %v2224_v17 }
  0x7a   :  { %723 = vmatpush1.bf16.msra.mxu1 %v2226_v18  ;;  %683 = vmatprep.subr.bf16.mxu0 %v2230_v19 }
  0x7b   :  { %724 = vmatprep.subr.bf16.mxu1 %v2233_v20 }
  0x7d   :  { %684 = vmatpush1.bf16.msra.mxu0 %v2237_v21 }
  0x7e   :  { %725 = vmatpush1.bf16.msra.mxu1 %v2240_v22  ;;  %685 = vmatprep.subr.bf16.mxu0 %v2245_v23 }
  0x7f   :  { %726 = vmatprep.subr.bf16.mxu1 %v2249_v24 }
  0x81   :  { %686 = vmatpush1.bf16.msra.mxu0 %v2252_v26 }
  0x82   :  { %727 = vmatpush1.bf16.msra.mxu1 %v2256_v27  ;;  %687 = vmatprep.subr.bf16.mxu0 %v2258_v28 }
  0x83   :  { %728 = vmatprep.subr.bf16.mxu1 %v2261_v29 }
  0x85   :  { %688 = vmatpush1.bf16.msra.mxu0 %v2266_v30 }
  0x86   :  { %729 = vmatpush1.bf16.msra.mxu1 %v2268_v31  ;;  %689 = vmatprep.subr.bf16.mxu0 %v2273_v33 }
  0x87   :  { %730 = vmatprep.subr.bf16.mxu1 %v2277_v34 }
  0x89   :  { %690 = vmatpush1.bf16.msra.mxu0 %v2279_v35 }
  0x8a   :  { %731 = vmatpush1.bf16.msra.mxu1 %v2281_v36  ;;  %691 = vmatprep.subr.bf16.mxu0 %v2283_v37 }
  0x8b   :  { %732 = vmatprep.subr.bf16.mxu1 %v2286_v38 }
  0x8d   :  { %692 = vmatpush1.bf16.msra.mxu0 %v2291_v39 }
  0x8e   :  { %733 = vmatpush1.bf16.msra.mxu1 %v2299_v40  ;;  %802 = vmatprep.subr.bf16.mxu0 %v2193_v6 }
  0x8f   :  { %843 = vmatprep.subr.bf16.mxu1 %v2195_v7 }
 0x123   :  { %v2346_v50 = vpop.f32.mrb[0].mxu0  ;;  %v2348_v51 = vpop.f32.mrb[0].mxu1 }
 0x124   :  { %v211_v54 = vpop.f32.mrb[1].mxu0  ;;  %v284_v55 = vpop.f32.mrb[1].mxu1 }
 0x125   :  { %v213_v57 = vpop.f32.mrb[2].mxu0  ;;  %v286_v58 = vpop.f32.mrb[2].mxu1 }
 0x126   :  { %v2352_v59 = vadd.f32 %v213_v57, %v105_v53  ;;  %v215_v60 = vpop.f32.mrb[3].mxu0  ;;  %v2355_v61 = vadd.f32 %v286_v58, %v2344_v49  ;;  %v288_v62 = vpop.f32.mrb[3].mxu1 }
 0x127   :  { %v2357_v63 = vadd.f32 %v215_v60, %v109_v56  ;;  %v2360_v1 = vadd.f32 %v288_v62, %v2350_v52 }
 0x12b   :  { %v219_v2 = vpop.f32.mrb[4].mxu0  ;;  %v292_v3 = vpop.f32.mrb[4].mxu1 }
 0x12c   :  { %v2362_v4 = vadd.f32 %v219_v2, %v105_v53  ;;  %v221_v5 = vpop.f32.mrb[5].mxu0  ;;  %v2365_v14 = vadd.f32 %v292_v3, %v2344_v49  ;;  %v294_v25 = vpop.f32.mrb[5].mxu1 }
 0x12d   :  { %v2367_v32 = vadd.f32 %v221_v5, %v109_v56  ;;  %v223_v41 = vpop.f32.mrb[6].mxu0  ;;  %v2370_v42 = vadd.f32 %v294_v25, %v2350_v52  ;;  %v296_v43 = vpop.f32.mrb[6].mxu1 }
 0x12e   :  { %v2372_v44 = vadd.f32 %v223_v41, %v105_v53  ;;  %v225_v45 = vpop.f32.mrb[7].mxu0  ;;  %v2375_v46 = vadd.f32 %v296_v43, %v2344_v49  ;;  %v298_v47 = vpop.f32.mrb[7].mxu1 }
 0x12f   :  { %2772 = vst [vmem:[#allocation18_spill] sm:$0xff] %v2370_v42  ;;  %v2377_v48 = vadd.f32 %v225_v45, %v109_v56  ;;  %v2380_v57 = vadd.f32 %v298_v47, %v2350_v52 }
 0x130   :  { %2773 = vst [vmem:[#allocation19_spill] sm:$0xff] %v2372_v44  ;;  %2774 = vst [vmem:[#allocation20_spill] sm:$0xff] %v2375_v46 }
 0x131   :  { %2775 = vst [vmem:[#allocation21_spill] sm:$0xff] %v2377_v48  ;;  %2776 = vst [vmem:[#allocation22_spill] sm:$0xff] %v2380_v57 }
 0x133   :  { %v229_v58 = vpop.f32.mrb[8].mxu0  ;;  %v302_v60 = vpop.f32.mrb[8].mxu1 }
 0x134   :  { %v2382_v62 = vadd.f32 %v229_v58, %v105_v53  ;;  %v231_v2 = vpop.f32.mrb[9].mxu0  ;;  %v2385_v3 = vadd.f32 %v302_v60, %v2344_v49  ;;  %v304_v5 = vpop.f32.mrb[9].mxu1 }
 0x135   :  { %v2387_v25 = vadd.f32 %v231_v2, %v109_v56  ;;  %v233_v41 = vpop.f32.mrb[10].mxu0  ;;  %v2390_v43 = vadd.f32 %v304_v5, %v2350_v52  ;;  %v306_v45 = vpop.f32.mrb[10].mxu1 }
 0x136   :  { %2777 = vst [vmem:[#allocation23_spill] sm:$0xff] %v2382_v62  ;;  %2778 = vst [vmem:[#allocation24_spill] sm:$0xff] %v2385_v3  ;;  %v2392_v0 = vadd.f32 %v233_v41, %v105_v53  ;;  %v235_v47 = vpop.f32.mrb[11].mxu0  ;;  %v2395_v57 = vadd.f32 %v306_v45, %v2344_v49  ;;  %v308_v58 = vpop.f32.mrb[11].mxu1 }
 0x137   :  { %2779 = vst [vmem:[#allocation25_spill] sm:$0xff] %v2387_v25  ;;  %2780 = vst [vmem:[#allocation26_spill] sm:$0xff] %v2390_v43  ;;  %v2397_v62 = vadd.f32 %v235_v47, %v109_v56  ;;  %v2400_v60 = vadd.f32 %v308_v58, %v2350_v52 }
 0x138   :  { %2781 = vst [vmem:[#allocation27_spill] sm:$0xff] %v2392_v0  ;;  %2782 = vst [vmem:[#allocation28_spill] sm:$0xff] %v2395_v57 }
 0x139   :  { %2783 = vst [vmem:[#allocation29_spill] sm:$0xff] %v2397_v62  ;;  %2784 = vst [vmem:[#allocation30_spill] sm:$0xff] %v2400_v60 }
 0x13b   :  { %v239_v3 = vpop.f32.mrb[12].mxu0  ;;  %v312_v2 = vpop.f32.mrb[12].mxu1 }
 0x13c   :  { %v2402_v25 = vadd.f32 %v239_v3, %v105_v53  ;;  %v241_v48 = vpop.f32.mrb[13].mxu0  ;;  %v2405_v5 = vadd.f32 %v312_v2, %v2344_v49  ;;  %v314_v41 = vpop.f32.mrb[13].mxu1 }
 0x13d   :  { %v2407_v0 = vadd.f32 %v241_v48, %v109_v56  ;;  %v243_v43 = vpop.f32.mrb[14].mxu0  ;;  %v2410_v45 = vadd.f32 %v314_v41, %v2350_v52  ;;  %v316_v47 = vpop.f32.mrb[14].mxu1  ;;  %v210_v48 = vadd.f32 %v2346_v50, %v105_v53  ;;  %v283_v41 = vadd.f32 %v2348_v51, %v2344_v49 }
 0x13e   :  { %2785 = vst [vmem:[#allocation31_spill] sm:$0xff] %v2402_v25  ;;  %2786 = vst [vmem:[#allocation32_spill] sm:$0xff] %v2405_v5  ;;  %v2412_v62 = vadd.f32 %v243_v43, %v105_v53  ;;  %v245_v58 = vpop.f32.mrb[15].mxu0  ;;  %v2415_v60 = vadd.f32 %v316_v47, %v2344_v49  ;;  %v318_v3 = vpop.f32.mrb[15].mxu1  ;;  %v285_v43 = vadd.f32 %v284_v55, %v2350_v52 }
 0x13f   :  { %2787 = vst [vmem:[#allocation33_spill] sm:$0xff] %v2407_v0  ;;  %2788 = vst [vmem:[#allocation34_spill] sm:$0xff] %v2410_v45  ;;  %v2417_v25 = vadd.f32 %v245_v58, %v109_v56  ;;  %v2420_v2 = vadd.f32 %v318_v3, %v2350_v52  ;;  %v212_v0 = vadd.f32 %v211_v54, %v109_v56 }
 0x140   :  { %2789 = vst [vmem:[#allocation35_spill] sm:$0xff] %v2412_v62  ;;  %2790 = vst [vmem:[#allocation36_spill] sm:$0xff] %v2415_v60 }
 0x141   :  { %2791 = vst [vmem:[#allocation37_spill] sm:$0xff] %v2417_v25  ;;  %2792 = vst [vmem:[#allocation38_spill] sm:$0xff] %v2420_v2 }
 0x143   :  { %v587_v45 = vpop.f32.mrb[16].mxu0 }
 0x144   :  { %v635_v62 = vadd.f32 %v587_v45, %v210_v48  ;;  %v628_v5 = vpop.f32.mrb[16].mxu1  ;;  %v589_v57 = vpop.f32.mrb[17].mxu0 }
 0x145   :  { %v637_v47 = vadd.f32 %v628_v5, %v283_v41  ;;  %v636_v60 = vadd.f32 %v589_v57, %v212_v0  ;;  %v630_v46 = vpop.f32.mrb[17].mxu1  ;;  %v591_v58 = vpop.f32.mrb[18].mxu0 }
 0x146   :  { %v639_v25 = vpack.c.bf16 %v635_v62, %v635_v62  ;;  %v638_v44 = vadd.f32 %v630_v46, %v285_v43  ;;  %v592_v3 = vpop.f32.mrb[19].mxu0  ;;  %v632_v2 = vpop.f32.mrb[18].mxu1 }
 0x147   :  { %v640_v42 = vpack.c.bf16 %v636_v60, %v636_v60  ;;  %v633_v50 = vpop.f32.mrb[19].mxu1  ;;  %v641_v49 = vpack.c.bf16 %v637_v47, %v637_v47 }
 0x148   :  { %v643_v53 = vmul.bf16 1056980736, %v639_v25  ;;  %v642_v56 = vpack.c.bf16 %v638_v44, %v638_v44 }
 0x149   :  { %v644_v54 = vmul.bf16 1056980736, %v640_v42  ;;  %v645_v51 = vmul.bf16 1056980736, %v641_v49 }
 0x14a   :  { %1846 = vtanh.bf16 %v643_v53  ;;  %v2793_v53 = vmov 0  }
 0x14b   :  { %1848 = vtanh.bf16 %v644_v54 }
 0x14c   :  { %1850 = vtanh.bf16 %v642_v56 }
 0x14d   :  { %1852 = vtanh.bf16 %v645_v51 }
 0x155   :  { %v1847_v52 = vpop.eup %1846 }
 0x156   :  { %v649_v55 = vadd.bf16 1065369472, %v1847_v52  ;;  %v1849_v0 = vpop.eup %1848 }
 0x157   :  { %v1851_v57 = vpop.eup %1850  ;;  %v650_v62 = vadd.bf16 1065369472, %v1849_v0 }
 0x158   :  { %v652_v5 = vmul.bf16 1056980736, %v649_v55  ;;  %v656_v2 = vunpack.c.l.bf16 %v1851_v57  ;;  %v1853_v42 = vpop.eup %1852 }
 0x159   :  { %v653_v45 = vmul.bf16 1056980736, %v650_v62  ;;  %v651_v41 = vadd.bf16 1065369472, %v1853_v42 }
 0x15a   :  { %v657_v46 = vunpack.c.l.bf16 %v652_v5 }
 0x15b   :  { %v658_v60 = vunpack.c.l.bf16 %v653_v45  ;;  %v654_v43 = vmul.bf16 1056980736, %v651_v41 }
 0x15c   :  { %v661_v48 = vmul.f32 %v657_v46, %v656_v2 }
 0x15d   :  { %v660_v25 = vmul.f32 0.0, %v658_v60  ;;  %v659_v47 = vunpack.c.l.bf16 %v654_v43 }
 0x15f   :  { %v2426_v44 = vadd.f32 %v661_v48, %v660_v25 }
 0x161   :  { %1854 = vtanh.f32 %v2426_v44 }
 0x16b   :  { %v1855_v58 = vpop.eup %1854 }
 0x16c   :  { %v664_v3 = vmul.f32 %v1855_v58, %v659_v47 }
 0x16e   :  { %v676_v50 = vpack.c.bf16 %v664_v3, %v664_v3 }
 0x170   :  { %710 = vmatmul.mubr.bf16.vlgmr.msra.gmra.mrb[20].mxu0 %v676_v50  ;;  %751 = vmatmul.mubr.bf16.vlgmr.msra.gmra.mrb[20].mxu1 %v676_v50 }
 0x171   :  { %803 = vmatpush1.bf16.msra.mxu0 %v2197_v8  ;;  %844 = vmatpush1.bf16.msra.mxu1 %v2200_v9 }
 0x172   :  { %804 = vmatprep.subr.bf16.mxu0 %v2204_v10  ;;  %845 = vmatprep.subr.bf16.mxu1 %v2208_v11 }
 0x173   :  { %834 = vmatprep.mubr.bf16.mxu0 %v2793_v53  ;;  %875 = vmatprep.mubr.bf16.mxu1 %v2793_v53 }
 0x175   :  { %805 = vmatpush1.bf16.msra.mxu0 %v2210_v12  ;;  %846 = vmatpush1.bf16.msra.mxu1 %v2212_v13 }
 0x176   :  { %806 = vmatprep.subr.bf16.mxu0 %v2218_v15  ;;  %847 = vmatprep.subr.bf16.mxu1 %v2221_v16 }
 0x179   :  { %807 = vmatpush1.bf16.msra.mxu0 %v2224_v17  ;;  %848 = vmatpush1.bf16.msra.mxu1 %v2226_v18 }
 0x17a   :  { %808 = vmatprep.subr.bf16.mxu0 %v2230_v19  ;;  %849 = vmatprep.subr.bf16.mxu1 %v2233_v20 }
 0x17d   :  { %809 = vmatpush1.bf16.msra.mxu0 %v2237_v21  ;;  %850 = vmatpush1.bf16.msra.mxu1 %v2240_v22 }
 0x17e   :  { %810 = vmatprep.subr.bf16.mxu0 %v2245_v23  ;;  %851 = vmatprep.subr.bf16.mxu1 %v2249_v24 }
 0x181   :  { %811 = vmatpush1.bf16.msra.mxu0 %v2252_v26  ;;  %852 = vmatpush1.bf16.msra.mxu1 %v2256_v27 }
 0x182   :  { %812 = vmatprep.subr.bf16.mxu0 %v2258_v28  ;;  %853 = vmatprep.subr.bf16.mxu1 %v2261_v29 }
 0x185   :  { %813 = vmatpush1.bf16.msra.mxu0 %v2266_v30  ;;  %854 = vmatpush1.bf16.msra.mxu1 %v2268_v31 }
 0x186   :  { %814 = vmatprep.subr.bf16.mxu0 %v2273_v33  ;;  %855 = vmatprep.subr.bf16.mxu1 %v2277_v34 }
 0x189   :  { %815 = vmatpush1.bf16.msra.mxu0 %v2279_v35  ;;  %856 = vmatpush1.bf16.msra.mxu1 %v2281_v36 }
 0x18a   :  { %816 = vmatprep.subr.bf16.mxu0 %v2283_v37  ;;  %857 = vmatprep.subr.bf16.mxu1 %v2286_v38 }
 0x18d   :  { %817 = vmatpush1.bf16.msra.mxu0 %v2291_v39  ;;  %858 = vmatpush1.bf16.msra.mxu1 %v2299_v40 }
 0x18e   :  { %927 = vmatprep.subr.bf16.mxu0 %v2193_v6  ;;  %968 = vmatprep.subr.bf16.mxu1 %v2195_v7 }
 0x243   :  { %v711_v54 = vpop.f32.mrb[20].mxu0  ;;  %v752_v56 = vpop.f32.mrb[20].mxu1 }
 0x244   :  { %v759_v49 = vadd.f32 %v711_v54, %v2352_v59  ;;  %v761_v51 = vadd.f32 %v752_v56, %v2355_v61  ;;  %v713_v52 = vpop.f32.mrb[21].mxu0  ;;  %v754_v55 = vpop.f32.mrb[21].mxu1 }
 0x245   :  { %v760_v0 = vadd.f32 %v713_v52, %v2357_v63  ;;  %v762_v57 = vadd.f32 %v754_v55, %v2360_v1  ;;  %v715_v5 = vpop.f32.mrb[22].mxu0  ;;  %v756_v62 = vpop.f32.mrb[22].mxu1 }
 0x246   :  { %v763_v46 = vpack.c.bf16 %v759_v49, %v759_v49  ;;  %v716_v45 = vpop.f32.mrb[23].mxu0  ;;  %v757_v2 = vpop.f32.mrb[23].mxu1  ;;  %v765_v59 = vpack.c.bf16 %v761_v51, %v761_v51 }
 0x247   :  { %v764_v60 = vpack.c.bf16 %v760_v0, %v760_v0  ;;  %v766_v48 = vpack.c.bf16 %v762_v57, %v762_v57 }
 0x248   :  { %v767_v25 = vmul.bf16 1056980736, %v763_v46  ;;  %v769_v61 = vmul.bf16 1056980736, %v765_v59 }
 0x249   :  { %v768_v42 = vmul.bf16 1056980736, %v764_v60 }
 0x24a   :  { %1856 = vtanh.bf16 %v767_v25 }
 0x24b   :  { %1858 = vtanh.bf16 %v766_v48 }
 0x24c   :  { %1860 = vtanh.bf16 %v768_v42 }
 0x24d   :  { %1862 = vtanh.bf16 %v769_v61  ;;  %v2794_v61 = vld [vmem:[#allocation18_spill] sm:$0xff] }
 0x255   :  { %v1857_v41 = vpop.eup %1856 }
 0x256   :  { %v1859_v43 = vpop.eup %1858  ;;  %v773_v63 = vadd.bf16 1065369472, %v1857_v41 }
 0x257   :  { %v1861_v47 = vpop.eup %1860  ;;  %v780_v54 = vunpack.c.l.bf16 %v1859_v43 }
 0x258   :  { %v776_v1 = vmul.bf16 1056980736, %v773_v63  ;;  %v774_v58 = vadd.bf16 1065369472, %v1861_v47  ;;  %v1863_v55 = vpop.eup %1862 }
 0x259   :  { %v775_v51 = vadd.bf16 1065369472, %v1863_v55 }
 0x25a   :  { %v781_v3 = vunpack.c.l.bf16 %v776_v1  ;;  %v777_v50 = vmul.bf16 1056980736, %v774_v58 }
 0x25b   :  { %v778_v57 = vmul.bf16 1056980736, %v775_v51 }
 0x25c   :  { %v782_v56 = vunpack.c.l.bf16 %v777_v50  ;;  %v785_v49 = vmul.f32 %v781_v3, %v780_v54 }
 0x25d   :  { %v783_v5 = vunpack.c.l.bf16 %v778_v57 }
 0x25e   :  { %v784_v52 = vmul.f32 %v782_v56, %v2426_v44 }
 0x260   :  { %v2468_v0 = vadd.f32 %v785_v49, %v784_v52 }
 0x262   :  { %1864 = vtanh.f32 %v2468_v0 }
 0x26c   :  { %v1865_v62 = vpop.eup %1864 }
 0x26d   :  { %v788_v46 = vmul.f32 %v1865_v62, %v783_v5 }
 0x26f   :  { %v801_v45 = vpack.c.bf16 %v788_v46, %v788_v46 }
 0x271   :  { %835 = vmatmul.mubr.bf16.vlgmr.msra.gmra.mrb[24].mxu0 %v801_v45  ;;  %876 = vmatmul.mubr.bf16.vlgmr.msra.gmra.mrb[24].mxu1 %v801_v45 }
 0x272   :  { %928 = vmatpush1.bf16.msra.mxu0 %v2197_v8  ;;  %969 = vmatpush1.bf16.msra.mxu1 %v2200_v9 }
 0x273   :  { %929 = vmatprep.subr.bf16.mxu0 %v2204_v10  ;;  %970 = vmatprep.subr.bf16.mxu1 %v2208_v11 }
 0x274   :  { %959 = vmatprep.mubr.bf16.mxu0 %v2793_v53  ;;  %1000 = vmatprep.mubr.bf16.mxu1 %v2793_v53 }
 0x276   :  { %930 = vmatpush1.bf16.msra.mxu0 %v2210_v12  ;;  %971 = vmatpush1.bf16.msra.mxu1 %v2212_v13 }
 0x277   :  { %931 = vmatprep.subr.bf16.mxu0 %v2218_v15  ;;  %972 = vmatprep.subr.bf16.mxu1 %v2221_v16 }
 0x27a   :  { %932 = vmatpush1.bf16.msra.mxu0 %v2224_v17  ;;  %973 = vmatpush1.bf16.msra.mxu1 %v2226_v18 }
 0x27b   :  { %933 = vmatprep.subr.bf16.mxu0 %v2230_v19  ;;  %974 = vmatprep.subr.bf16.mxu1 %v2233_v20 }
 0x27e   :  { %934 = vmatpush1.bf16.msra.mxu0 %v2237_v21  ;;  %975 = vmatpush1.bf16.msra.mxu1 %v2240_v22 }
 0x27f   :  { %935 = vmatprep.subr.bf16.mxu0 %v2245_v23  ;;  %976 = vmatprep.subr.bf16.mxu1 %v2249_v24 }
 0x282   :  { %936 = vmatpush1.bf16.msra.mxu0 %v2252_v26  ;;  %977 = vmatpush1.bf16.msra.mxu1 %v2256_v27 }
 0x283   :  { %937 = vmatprep.subr.bf16.mxu0 %v2258_v28  ;;  %978 = vmatprep.subr.bf16.mxu1 %v2261_v29 }
 0x286   :  { %938 = vmatpush1.bf16.msra.mxu0 %v2266_v30  ;;  %979 = vmatpush1.bf16.msra.mxu1 %v2268_v31 }
 0x287   :  { %939 = vmatprep.subr.bf16.mxu0 %v2273_v33  ;;  %980 = vmatprep.subr.bf16.mxu1 %v2277_v34 }
 0x28a   :  { %940 = vmatpush1.bf16.msra.mxu0 %v2279_v35  ;;  %981 = vmatpush1.bf16.msra.mxu1 %v2281_v36 }
 0x28b   :  { %941 = vmatprep.subr.bf16.mxu0 %v2283_v37  ;;  %982 = vmatprep.subr.bf16.mxu1 %v2286_v38 }
 0x28e   :  { %942 = vmatpush1.bf16.msra.mxu0 %v2291_v39  ;;  %983 = vmatpush1.bf16.msra.mxu1 %v2299_v40 }
 0x28f   :  { %1052 = vmatprep.subr.bf16.mxu0 %v2193_v6  ;;  %1093 = vmatprep.subr.bf16.mxu1 %v2195_v7 }
 0x344   :  { %v836_v44 = vpop.f32.mrb[24].mxu0  ;;  %v877_v2 = vpop.f32.mrb[24].mxu1 }
 0x345   :  { %v884_v60 = vadd.f32 %v836_v44, %v2362_v4  ;;  %v886_v48 = vadd.f32 %v877_v2, %v2365_v14  ;;  %v838_v25 = vpop.f32.mrb[25].mxu0  ;;  %v879_v42 = vpop.f32.mrb[25].mxu1 }
 0x346   :  { %v885_v59 = vadd.f32 %v838_v25, %v2367_v32  ;;  %v887_v41 = vadd.f32 %v879_v42, %v2794_v61  ;;  %v840_v43 = vpop.f32.mrb[26].mxu0  ;;  %v881_v63 = vpop.f32.mrb[26].mxu1 }
 0x347   :  { %v888_v47 = vpack.c.bf16 %v884_v60, %v884_v60  ;;  %v841_v1 = vpop.f32.mrb[27].mxu0  ;;  %v882_v58 = vpop.f32.mrb[27].mxu1  ;;  %v890_v4 = vpack.c.bf16 %v886_v48, %v886_v48 }
 0x348   :  { %v889_v3 = vpack.c.bf16 %v885_v59, %v885_v59  ;;  %v891_v50 = vpack.c.bf16 %v887_v41, %v887_v41 }
 0x349   :  { %v892_v54 = vmul.bf16 1056980736, %v888_v47  ;;  %v894_v14 = vmul.bf16 1056980736, %v890_v4  ;;  %v2798_v47 = vld [vmem:[#allocation22_spill] sm:$0xff] }
 0x34a   :  { %v893_v56 = vmul.bf16 1056980736, %v889_v3 }
 0x34b   :  { %1866 = vtanh.bf16 %v892_v54 }
 0x34c   :  { %1868 = vtanh.bf16 %v891_v50 }
 0x34d   :  { %1870 = vtanh.bf16 %v893_v56 }
 0x34e   :  { %1872 = vtanh.bf16 %v894_v14 }
 0x356   :  { %v1867_v49 = vpop.eup %1866 }
 0x357   :  { %v1869_v52 = vpop.eup %1868  ;;  %v898_v32 = vadd.bf16 1065369472, %v1867_v49 }
 0x358   :  { %v1871_v55 = vpop.eup %1870  ;;  %v905_v46 = vunpack.c.l.bf16 %v1869_v52 }
 0x359   :  { %v901_v51 = vmul.bf16 1056980736, %v898_v32  ;;  %v899_v57 = vadd.bf16 1065369472, %v1871_v55  ;;  %v1873_v60 = vpop.eup %1872 }
 0x35a   :  { %v900_v48 = vadd.bf16 1065369472, %v1873_v60 }
 0x35b   :  { %v906_v5 = vunpack.c.l.bf16 %v901_v51  ;;  %v902_v62 = vmul.bf16 1056980736, %v899_v57 }
 0x35c   :  { %v903_v42 = vmul.bf16 1056980736, %v900_v48 }
 0x35d   :  { %v907_v45 = vunpack.c.l.bf16 %v902_v62  ;;  %v910_v44 = vmul.f32 %v906_v5, %v905_v46 }
 0x35e   :  { %v908_v59 = vunpack.c.l.bf16 %v903_v42 }
 0x35f   :  { %v909_v2 = vmul.f32 %v907_v45, %v2468_v0  ;;  %v2797_v0 = vld [vmem:[#allocation21_spill] sm:$0xff] }
 0x361   :  { %v2510_v25 = vadd.f32 %v910_v44, %v909_v2 }
 0x363   :  { %1874 = vtanh.f32 %v2510_v25 }
 0x36d   :  { %v1875_v61 = vpop.eup %1874 }
 0x36e   :  { %v913_v41 = vmul.f32 %v1875_v61, %v908_v59 }
 0x370   :  { %v926_v43 = vpack.c.bf16 %v913_v41, %v913_v41 }
 0x372   :  { %960 = vmatmul.mubr.bf16.vlgmr.msra.gmra.mrb[28].mxu0 %v926_v43  ;;  %1001 = vmatmul.mubr.bf16.vlgmr.msra.gmra.mrb[28].mxu1 %v926_v43 }
 0x373   :  { %1053 = vmatpush1.bf16.msra.mxu0 %v2197_v8  ;;  %1094 = vmatpush1.bf16.msra.mxu1 %v2200_v9 }
 0x374   :  { %1054 = vmatprep.subr.bf16.mxu0 %v2204_v10  ;;  %1095 = vmatprep.subr.bf16.mxu1 %v2208_v11  ;;  %v2795_v10 = vld [vmem:[#allocation19_spill] sm:$0xff] }
 0x375   :  { %1084 = vmatprep.mubr.bf16.mxu0 %v2793_v53  ;;  %1125 = vmatprep.mubr.bf16.mxu1 %v2793_v53 }
 0x377   :  { %1055 = vmatpush1.bf16.msra.mxu0 %v2210_v12  ;;  %1096 = vmatpush1.bf16.msra.mxu1 %v2212_v13  ;;  %v2796_v12 = vld [vmem:[#allocation20_spill] sm:$0xff] }
 0x378   :  { %1056 = vmatprep.subr.bf16.mxu0 %v2218_v15  ;;  %1097 = vmatprep.subr.bf16.mxu1 %v2221_v16 }
 0x37b   :  { %1057 = vmatpush1.bf16.msra.mxu0 %v2224_v17  ;;  %1098 = vmatpush1.bf16.msra.mxu1 %v2226_v18 }
 0x37c   :  { %1058 = vmatprep.subr.bf16.mxu0 %v2230_v19  ;;  %1099 = vmatprep.subr.bf16.mxu1 %v2233_v20 }
 0x37f   :  { %1059 = vmatpush1.bf16.msra.mxu0 %v2237_v21  ;;  %1100 = vmatpush1.bf16.msra.mxu1 %v2240_v22 }
 0x380   :  { %1060 = vmatprep.subr.bf16.mxu0 %v2245_v23  ;;  %1101 = vmatprep.subr.bf16.mxu1 %v2249_v24 }
 0x383   :  { %1061 = vmatpush1.bf16.msra.mxu0 %v2252_v26  ;;  %1102 = vmatpush1.bf16.msra.mxu1 %v2256_v27 }
 0x384   :  { %1062 = vmatprep.subr.bf16.mxu0 %v2258_v28  ;;  %1103 = vmatprep.subr.bf16.mxu1 %v2261_v29 }
 0x387   :  { %1063 = vmatpush1.bf16.msra.mxu0 %v2266_v30  ;;  %1104 = vmatpush1.bf16.msra.mxu1 %v2268_v31 }
 0x388   :  { %1064 = vmatprep.subr.bf16.mxu0 %v2273_v33  ;;  %1105 = vmatprep.subr.bf16.mxu1 %v2277_v34 }
 0x38b   :  { %1065 = vmatpush1.bf16.msra.mxu0 %v2279_v35  ;;  %1106 = vmatpush1.bf16.msra.mxu1 %v2281_v36 }
 0x38c   :  { %1066 = vmatprep.subr.bf16.mxu0 %v2283_v37  ;;  %1107 = vmatprep.subr.bf16.mxu1 %v2286_v38 }
 0x38f   :  { %1067 = vmatpush1.bf16.msra.mxu0 %v2291_v39  ;;  %1108 = vmatpush1.bf16.msra.mxu1 %v2299_v40 }
 0x390   :  { %1177 = vmatprep.subr.bf16.mxu0 %v2193_v6  ;;  %1218 = vmatprep.subr.bf16.mxu1 %v2195_v7 }
 0x445   :  { %v961_v8 = vpop.f32.mrb[28].mxu0  ;;  %v1002_v9 = vpop.f32.mrb[28].mxu1 }
 0x446   :  { %v1009_v11 = vadd.f32 %v961_v8, %v2795_v10  ;;  %v1011_v13 = vadd.f32 %v1002_v9, %v2796_v12  ;;  %v963_v15 = vpop.f32.mrb[29].mxu0  ;;  %v1004_v16 = vpop.f32.mrb[29].mxu1  ;;  %v2558_v12 = vld [vmem:[#allocation10 + $0x8] ss:$16 sps:$4 sm:$0xff]  }
 0x447   :  { %v1010_v63 = vadd.f32 %v963_v15, %v2797_v0  ;;  %v1012_v1 = vadd.f32 %v1004_v16, %v2798_v47  ;;  %v965_v58 = vpop.f32.mrb[30].mxu0  ;;  %v1006_v3 = vpop.f32.mrb[30].mxu1  ;;  %v2569_v15 = vld [vmem:[#allocation10 + $0x20] ss:$16 sps:$4 sm:$0xff]   ;;  %v2572_v16 = vld [vmem:[#allocation10 + $0x28] ss:$16 sps:$4 sm:$0xff]  }
 0x448   :  { %v1013_v50 = vpack.c.bf16 %v1009_v11, %v1009_v11  ;;  %v966_v54 = vpop.f32.mrb[31].mxu0  ;;  %v1007_v56 = vpop.f32.mrb[31].mxu1  ;;  %v1015_v49 = vpack.c.bf16 %v1011_v13, %v1011_v13  ;;  %v2555_v11 = vld [vmem:[#allocation10] ss:$16 sps:$4 sm:$0xff]   ;;  %v2564_v13 = vld [vmem:[#allocation10 + $0x2c] ss:$16 sps:$4 sm:$0xff]  }
 0x449   :  { %v1014_v6 = vpack.c.bf16 %v1010_v63, %v1010_v63  ;;  %v1016_v4 = vpack.c.bf16 %v1012_v1, %v1012_v1  ;;  %v2575_v0 = vld [vmem:[#allocation10 + $0x44] ss:$16 sps:$4 sm:$0xff]   ;;  %v2578_v63 = vld [vmem:[#allocation10 + $0x4c] ss:$16 sps:$4 sm:$0xff]  }
 0x44a   :  { %v1017_v7 = vmul.bf16 1056980736, %v1013_v50  ;;  %v1019_v52 = vmul.bf16 1056980736, %v1015_v49 }
 0x44b   :  { %v1018_v14 = vmul.bf16 1056980736, %v1014_v6 }
 0x44c   :  { %1876 = vtanh.bf16 %v1017_v7 }
 0x44d   :  { %1878 = vtanh.bf16 %v1016_v4 }
 0x44e   :  { %1880 = vtanh.bf16 %v1018_v14 }
 0x44f   :  { %1882 = vtanh.bf16 %v1019_v52 }
 0x457   :  { %v1877_v32 = vpop.eup %1876 }
 0x458   :  { %v1879_v55 = vpop.eup %1878  ;;  %v1023_v51 = vadd.bf16 1065369472, %v1877_v32 }
 0x459   :  { %v1881_v57 = vpop.eup %1880  ;;  %v1030_v44 = vunpack.c.l.bf16 %v1879_v55 }
 0x45a   :  { %v1026_v5 = vmul.bf16 1056980736, %v1023_v51  ;;  %v1024_v62 = vadd.bf16 1065369472, %v1881_v57  ;;  %v1883_v42 = vpop.eup %1882 }
 0x45b   :  { %v1025_v61 = vadd.bf16 1065369472, %v1883_v42  ;;  %v2633_v42 = vld [vmem:[#allocation10 + $0x64] ss:$16 sps:$4 sm:$0xff]  }
 0x45c   :  { %v1031_v46 = vunpack.c.l.bf16 %v1026_v5  ;;  %v1027_v45 = vmul.bf16 1056980736, %v1024_v62 }
 0x45d   :  { %v1028_v41 = vmul.bf16 1056980736, %v1025_v61  ;;  %v2639_v61 = vld [vmem:[#allocation10 + $0x60] ss:$16 sps:$4 sm:$0xff]  }
 0x45e   :  { %v1032_v2 = vunpack.c.l.bf16 %v1027_v45  ;;  %v1035_v60 = vmul.f32 %v1031_v46, %v1030_v44 }
 0x45f   :  { %v1033_v43 = vunpack.c.l.bf16 %v1028_v41  ;;  %v2642_v41 = vld [vmem:[#allocation10 + $0x68] ss:$16 sps:$4 sm:$0xff]  }
 0x460   :  { %v1034_v48 = vmul.f32 %v1032_v2, %v2510_v25  ;;  %v2561_v25 = vld [vmem:[#allocation10 + $0x24] ss:$16 sps:$4 sm:$0xff]  }
 0x462   :  { %v2552_v59 = vadd.f32 %v1035_v60, %v1034_v48  ;;  %v2627_v60 = vld [vmem:[#allocation10 + $0x40] ss:$16 sps:$4 sm:$0xff]   ;;  %v2630_v48 = vld [vmem:[#allocation10 + $0x48] ss:$16 sps:$4 sm:$0xff]  }
 0x464   :  { %1884 = vtanh.f32 %v2552_v59 }
 0x46e   :  { %v1885_v8 = vpop.eup %1884 }
 0x46f   :  { %v1038_v9 = vmul.f32 %v1885_v8, %v1033_v43  ;;  %v2645_v43 = vld [vmem:[#allocation10 + $0x84] ss:$16 sps:$4 sm:$0xff]   ;;  %v2648_v8 = vld [vmem:[#allocation10 + $0x8c] ss:$16 sps:$4 sm:$0xff]  }
 0x471   :  { %v1051_v10 = vpack.c.bf16 %v1038_v9, %v1038_v9  ;;  %v2651_v9 = vld [vmem:[#allocation10 + $0x80] ss:$16 sps:$4 sm:$0xff]  }
 0x473   :  { %1085 = vmatmul.mubr.bf16.vlgmr.msra.gmra.mrb[32].mxu0 %v1051_v10  ;;  %1126 = vmatmul.mubr.bf16.vlgmr.msra.gmra.mrb[32].mxu1 %v1051_v10  ;;  %v2654_v10 = vld [vmem:[#allocation10 + $0x88] ss:$16 sps:$4 sm:$0xff]  }
 0x474   :  { %1178 = vmatpush1.bf16.msra.mxu0 %v2555_v11  ;;  %1219 = vmatpush1.bf16.msra.mxu1 %v2558_v12 }
 0x475   :  { %1179 = vmatprep.subr.bf16.mxu0 %v2561_v25  ;;  %1220 = vmatprep.subr.bf16.mxu1 %v2564_v13 }
 0x476   :  { %1209 = vmatprep.mubr.bf16.mxu0 %v2793_v53  ;;  %1250 = vmatprep.mubr.bf16.mxu1 %v2793_v53 }
 0x478   :  { %1180 = vmatpush1.bf16.msra.mxu0 %v2569_v15  ;;  %1221 = vmatpush1.bf16.msra.mxu1 %v2572_v16 }
 0x479   :  { %1181 = vmatprep.subr.bf16.mxu0 %v2575_v0  ;;  %1222 = vmatprep.subr.bf16.mxu1 %v2578_v63 }
 0x47c   :  { %1182 = vmatpush1.bf16.msra.mxu0 %v2224_v17  ;;  %1223 = vmatpush1.bf16.msra.mxu1 %v2226_v18  ;;  %v2603_v17 = vld [vmem:[#allocation10 + $0x4] ss:$16 sps:$4 sm:$0xff]   ;;  %v2606_v18 = vld [vmem:[#allocation10 + $0xc] ss:$16 sps:$4 sm:$0xff]  }
 0x47d   :  { %1183 = vmatprep.subr.bf16.mxu0 %v2230_v19  ;;  %1224 = vmatprep.subr.bf16.mxu1 %v2233_v20 }
 0x480   :  { %1184 = vmatpush1.bf16.msra.mxu0 %v2237_v21  ;;  %1225 = vmatpush1.bf16.msra.mxu1 %v2240_v22  ;;  %v2799_v21 = vld [vmem:[#allocation23_spill] sm:$0xff] }
 0x481   :  { %1185 = vmatprep.subr.bf16.mxu0 %v2245_v23  ;;  %1226 = vmatprep.subr.bf16.mxu1 %v2249_v24  ;;  %v2800_v23 = vld [vmem:[#allocation24_spill] sm:$0xff] }
 0x484   :  { %1186 = vmatpush1.bf16.msra.mxu0 %v2252_v26  ;;  %1227 = vmatpush1.bf16.msra.mxu1 %v2256_v27 }
 0x485   :  { %1187 = vmatprep.subr.bf16.mxu0 %v2258_v28  ;;  %1228 = vmatprep.subr.bf16.mxu1 %v2261_v29  ;;  %v2801_v28 = vld [vmem:[#allocation25_spill] sm:$0xff] }
 0x488   :  { %1188 = vmatpush1.bf16.msra.mxu0 %v2266_v30  ;;  %1229 = vmatpush1.bf16.msra.mxu1 %v2268_v31  ;;  %v2802_v30 = vld [vmem:[#allocation26_spill] sm:$0xff] }
 0x489   :  { %1189 = vmatprep.subr.bf16.mxu0 %v2273_v33  ;;  %1230 = vmatprep.subr.bf16.mxu1 %v2277_v34 }
 0x48c   :  { %1190 = vmatpush1.bf16.msra.mxu0 %v2279_v35  ;;  %1231 = vmatpush1.bf16.msra.mxu1 %v2281_v36 }
 0x48d   :  { %1191 = vmatprep.subr.bf16.mxu0 %v2283_v37  ;;  %1232 = vmatprep.subr.bf16.mxu1 %v2286_v38 }
 0x490   :  { %1192 = vmatpush1.bf16.msra.mxu0 %v2291_v39  ;;  %1233 = vmatpush1.bf16.msra.mxu1 %v2299_v40 }
 0x491   :  { %1302 = vmatprep.subr.bf16.mxu0 %v2603_v17  ;;  %1343 = vmatprep.subr.bf16.mxu1 %v2606_v18 }
 0x546   :  { %v1086_v19 = vpop.f32.mrb[32].mxu0  ;;  %v1127_v20 = vpop.f32.mrb[32].mxu1 }
 0x547   :  { %v1134_v22 = vadd.f32 %v1086_v19, %v2799_v21  ;;  %v1136_v24 = vadd.f32 %v1127_v20, %v2800_v23  ;;  %v1088_v26 = vpop.f32.mrb[33].mxu0  ;;  %v1129_v27 = vpop.f32.mrb[33].mxu1  ;;  %v2657_v19 = vld [vmem:[#allocation10 + $0xa4] ss:$16 sps:$4 sm:$0xff]   ;;  %v2660_v20 = vld [vmem:[#allocation10 + $0xac] ss:$16 sps:$4 sm:$0xff]  }
 0x548   :  { %v1135_v29 = vadd.f32 %v1088_v26, %v2801_v28  ;;  %v1137_v31 = vadd.f32 %v1129_v27, %v2802_v30  ;;  %v1090_v33 = vpop.f32.mrb[34].mxu0  ;;  %v1131_v34 = vpop.f32.mrb[34].mxu1  ;;  %v2663_v21 = vld [vmem:[#allocation10 + $0xa0] ss:$16 sps:$4 sm:$0xff]   ;;  %v2669_v23 = vld [vmem:[#allocation10 + $0xc4] ss:$16 sps:$4 sm:$0xff]  }
 0x549   :  { %v1138_v35 = vpack.c.bf16 %v1134_v22, %v1134_v22  ;;  %v1091_v36 = vpop.f32.mrb[35].mxu0  ;;  %v1132_v37 = vpop.f32.mrb[35].mxu1  ;;  %v1140_v1 = vpack.c.bf16 %v1136_v24, %v1136_v24  ;;  %v2666_v22 = vld [vmem:[#allocation10 + $0xa8] ss:$16 sps:$4 sm:$0xff]   ;;  %v2672_v24 = vld [vmem:[#allocation10 + $0xcc] ss:$16 sps:$4 sm:$0xff]  }
 0x54a   :  { %v1139_v38 = vpack.c.bf16 %v1135_v29, %v1135_v29  ;;  %v1141_v39 = vpack.c.bf16 %v1137_v31, %v1137_v31  ;;  %v2675_v26 = vld [vmem:[#allocation10 + $0xc0] ss:$16 sps:$4 sm:$0xff]   ;;  %v2678_v27 = vld [vmem:[#allocation10 + $0xc8] ss:$16 sps:$4 sm:$0xff]   ;;  %v2681_v28 = vld [vmem:[#allocation10 + $0xe4] ss:$16 sps:$4 sm:$0xff]  }
 0x54b   :  { %v1142_v40 = vmul.bf16 1056980736, %v1138_v35  ;;  %v1144_v58 = vmul.bf16 1056980736, %v1140_v1  ;;  %v2684_v29 = vld [vmem:[#allocation10 + $0xec] ss:$16 sps:$4 sm:$0xff]  }
 0x54c   :  { %v1143_v47 = vmul.bf16 1056980736, %v1139_v38  ;;  %v2687_v30 = vld [vmem:[#allocation10 + $0xe0] ss:$16 sps:$4 sm:$0xff]   ;;  %v2690_v31 = vld [vmem:[#allocation10 + $0xe8] ss:$16 sps:$4 sm:$0xff]  }
 0x54d   :  { %1886 = vtanh.bf16 %v1142_v40  ;;  %v2803_v35 = vld [vmem:[#allocation27_spill] sm:$0xff]  ;;  %v2804_v37 = vld [vmem:[#allocation28_spill] sm:$0xff] }
 0x54e   :  { %1888 = vtanh.bf16 %v1141_v39 }
 0x54f   :  { %1890 = vtanh.bf16 %v1143_v47  ;;  %v2805_v47 = vld [vmem:[#allocation29_spill] sm:$0xff] }
 0x550   :  { %1892 = vtanh.bf16 %v1144_v58  ;;  %v2806_v58 = vld [vmem:[#allocation30_spill] sm:$0xff] }
 0x558   :  { %v1887_v3 = vpop.eup %1886 }
 0x559   :  { %v1889_v50 = vpop.eup %1888  ;;  %v1148_v54 = vadd.bf16 1065369472, %v1887_v3 }
 0x55a   :  { %v1891_v56 = vpop.eup %1890  ;;  %v1155_v49 = vunpack.c.l.bf16 %v1889_v50 }
 0x55b   :  { %v1151_v6 = vmul.bf16 1056980736, %v1148_v54  ;;  %v1149_v4 = vadd.bf16 1065369472, %v1891_v56  ;;  %v1893_v51 = vpop.eup %1892 }
 0x55c   :  { %v1150_v5 = vadd.bf16 1065369472, %v1893_v51 }
 0x55d   :  { %v1156_v7 = vunpack.c.l.bf16 %v1151_v6  ;;  %v1152_v14 = vmul.bf16 1056980736, %v1149_v4 }
 0x55e   :  { %v1153_v62 = vmul.bf16 1056980736, %v1150_v5 }
 0x55f   :  { %v1157_v52 = vunpack.c.l.bf16 %v1152_v14  ;;  %v1160_v32 = vmul.f32 %v1156_v7, %v1155_v49 }
 0x560   :  { %v1158_v46 = vunpack.c.l.bf16 %v1153_v62 }
 0x561   :  { %v1159_v55 = vmul.f32 %v1157_v52, %v2552_v59  ;;  %v2636_v59 = vld [vmem:[#allocation10 + $0x6c] ss:$16 sps:$4 sm:$0xff]  }
 0x563   :  { %v2614_v57 = vadd.f32 %v1160_v32, %v1159_v55 }
 0x565   :  { %1894 = vtanh.f32 %v2614_v57 }
 0x56f   :  { %v1895_v45 = vpop.eup %1894 }
 0x570   :  { %v1163_v44 = vmul.f32 %v1895_v45, %v1158_v46 }
 0x572   :  { %v1176_v2 = vpack.c.bf16 %v1163_v44, %v1163_v44 }
 0x574   :  { %1210 = vmatmul.mubr.bf16.vlgmr.msra.gmra.mrb[36].mxu0 %v1176_v2  ;;  %1251 = vmatmul.mubr.bf16.vlgmr.msra.gmra.mrb[36].mxu1 %v1176_v2 }
 0x575   :  { %1303 = vmatpush1.bf16.msra.mxu0 %v2555_v11  ;;  %1344 = vmatpush1.bf16.msra.mxu1 %v2558_v12 }
 0x576   :  { %1304 = vmatprep.subr.bf16.mxu0 %v2561_v25  ;;  %1345 = vmatprep.subr.bf16.mxu1 %v2564_v13 }
 0x577   :  { %1334 = vmatprep.mubr.bf16.mxu0 %v2793_v53  ;;  %1375 = vmatprep.mubr.bf16.mxu1 %v2793_v53 }
 0x579   :  { %1305 = vmatpush1.bf16.msra.mxu0 %v2569_v15  ;;  %1346 = vmatpush1.bf16.msra.mxu1 %v2572_v16 }
 0x57a   :  { %1306 = vmatprep.subr.bf16.mxu0 %v2575_v0  ;;  %1347 = vmatprep.subr.bf16.mxu1 %v2578_v63 }
 0x57d   :  { %1307 = vmatpush1.bf16.msra.mxu0 %v2627_v60  ;;  %1348 = vmatpush1.bf16.msra.mxu1 %v2630_v48 }
 0x57e   :  { %1308 = vmatprep.subr.bf16.mxu0 %v2633_v42  ;;  %1349 = vmatprep.subr.bf16.mxu1 %v2636_v59 }
 0x581   :  { %1309 = vmatpush1.bf16.msra.mxu0 %v2639_v61  ;;  %1350 = vmatpush1.bf16.msra.mxu1 %v2642_v41 }
 0x582   :  { %1310 = vmatprep.subr.bf16.mxu0 %v2645_v43  ;;  %1351 = vmatprep.subr.bf16.mxu1 %v2648_v8 }
 0x585   :  { %1311 = vmatpush1.bf16.msra.mxu0 %v2651_v9  ;;  %1352 = vmatpush1.bf16.msra.mxu1 %v2654_v10 }
 0x586   :  { %1312 = vmatprep.subr.bf16.mxu0 %v2657_v19  ;;  %1353 = vmatprep.subr.bf16.mxu1 %v2660_v20 }
 0x589   :  { %1313 = vmatpush1.bf16.msra.mxu0 %v2663_v21  ;;  %1354 = vmatpush1.bf16.msra.mxu1 %v2666_v22 }
 0x58a   :  { %1314 = vmatprep.subr.bf16.mxu0 %v2669_v23  ;;  %1355 = vmatprep.subr.bf16.mxu1 %v2672_v24 }
 0x58d   :  { %1315 = vmatpush1.bf16.msra.mxu0 %v2675_v26  ;;  %1356 = vmatpush1.bf16.msra.mxu1 %v2678_v27 }
 0x58e   :  { %1316 = vmatprep.subr.bf16.mxu0 %v2681_v28  ;;  %1357 = vmatprep.subr.bf16.mxu1 %v2684_v29 }
 0x591   :  { %1317 = vmatpush1.bf16.msra.mxu0 %v2687_v30  ;;  %1358 = vmatpush1.bf16.msra.mxu1 %v2690_v31 }
 0x592   :  { %1427 = vmatprep.subr.bf16.mxu0 %v2603_v17  ;;  %1468 = vmatprep.subr.bf16.mxu1 %v2606_v18 }
 0x647   :  { %v1211_v33 = vpop.f32.mrb[36].mxu0  ;;  %v1252_v34 = vpop.f32.mrb[36].mxu1 }
 0x648   :  { %v1259_v36 = vadd.f32 %v1211_v33, %v2803_v35  ;;  %v1261_v38 = vadd.f32 %v1252_v34, %v2804_v37  ;;  %v1213_v39 = vpop.f32.mrb[37].mxu0  ;;  %v1254_v40 = vpop.f32.mrb[37].mxu1 }
 0x649   :  { %v1260_v1 = vadd.f32 %v1213_v39, %v2805_v47  ;;  %v1262_v3 = vadd.f32 %v1254_v40, %v2806_v58  ;;  %v1215_v50 = vpop.f32.mrb[38].mxu0  ;;  %v1256_v54 = vpop.f32.mrb[38].mxu1 }
 0x64a   :  { %v1263_v56 = vpack.c.bf16 %v1259_v36, %v1259_v36  ;;  %v1216_v6 = vpop.f32.mrb[39].mxu0  ;;  %v1257_v4 = vpop.f32.mrb[39].mxu1  ;;  %v1265_v49 = vpack.c.bf16 %v1261_v38, %v1261_v38 }
 0x64b   :  { %v1264_v17 = vpack.c.bf16 %v1260_v1, %v1260_v1  ;;  %v1266_v7 = vpack.c.bf16 %v1262_v3, %v1262_v3 }
 0x64c   :  { %v1267_v18 = vmul.bf16 1056980736, %v1263_v56  ;;  %v1269_v52 = vmul.bf16 1056980736, %v1265_v49 }
 0x64d   :  { %v1268_v14 = vmul.bf16 1056980736, %v1264_v17 }
 0x64e   :  { %1896 = vtanh.bf16 %v1267_v18 }
 0x64f   :  { %1898 = vtanh.bf16 %v1266_v7 }
 0x650   :  { %1900 = vtanh.bf16 %v1268_v14 }
 0x651   :  { %1902 = vtanh.bf16 %v1269_v52  ;;  %v1838_v52 = vld [vmem:[#allocation11] sm:$0xff]  }
 0x659   :  { %v1897_v32 = vpop.eup %1896 }
 0x65a   :  { %v1899_v55 = vpop.eup %1898  ;;  %v1273_v51 = vadd.bf16 1065369472, %v1897_v32  ;;  %v2086_v32 = vmov 0.0  }
 0x65b   :  { %v1901_v5 = vpop.eup %1900  ;;  %v1280_v2 = vunpack.c.l.bf16 %v1899_v55  ;;  %v1839_v55 = vld [vmem:[#allocation11 + $0x8] sm:$0xff]  }
 0x65c   :  { %v1276_v62 = vmul.bf16 1056980736, %v1273_v51  ;;  %v1274_v46 = vadd.bf16 1065369472, %v1901_v5  ;;  %v1903_v36 = vpop.eup %1902  ;;  %v1840_v51 = vld [vmem:[#allocation11 + $0x10] sm:$0xff]   ;;  %v1841_v5 = vld [vmem:[#allocation11 + $0x18] sm:$0xff]  }
 0x65d   :  { %v1275_v38 = vadd.bf16 1065369472, %v1903_v36  ;;  %v2812_v36 = vld [vmem:[#allocation36_spill] sm:$0xff] }
 0x65e   :  { %v1281_v45 = vunpack.c.l.bf16 %v1276_v62  ;;  %v1277_v44 = vmul.bf16 1056980736, %v1274_v46  ;;  %v1842_v62 = vld [vmem:[#allocation11 + $0x20] sm:$0xff]   ;;  %v1843_v46 = vld [vmem:[#allocation11 + $0x28] sm:$0xff]  }
 0x65f   :  { %v1278_v39 = vmul.bf16 1056980736, %v1275_v38 }
 0x660   :  { %v1282_v33 = vunpack.c.l.bf16 %v1277_v44  ;;  %v1285_v34 = vmul.f32 %v1281_v45, %v1280_v2  ;;  %v1844_v45 = vld [vmem:[#allocation11 + $0x30] sm:$0xff]   ;;  %v1845_v44 = vld [vmem:[#allocation11 + $0x38] sm:$0xff]  }
 0x661   :  { %v1283_v40 = vunpack.c.l.bf16 %v1278_v39 }
 0x662   :  { %v1284_v35 = vmul.f32 %v1282_v33, %v2614_v57 }
 0x664   :  { %v2700_v37 = vadd.f32 %v1285_v34, %v1284_v35  ;;  %v2811_v34 = vld [vmem:[#allocation35_spill] sm:$0xff] }
 0x666   :  { %1904 = vtanh.f32 %v2700_v37 }
 0x670   :  { %v1905_v47 = vpop.eup %1904 }
 0x671   :  { %v1288_v1 = vmul.f32 %v1905_v47, %v1283_v40  ;;  %v2813_v40 = vld [vmem:[#allocation37_spill] sm:$0xff] }
 0x673   :  { %v1301_v58 = vpack.c.bf16 %v1288_v1, %v1288_v1  ;;  %v2814_v1 = vld [vmem:[#allocation38_spill] sm:$0xff] }
 0x675   :  { %1335 = vmatmul.mubr.bf16.vlgmr.msra.gmra.mrb[40].mxu0 %v1301_v58  ;;  %1376 = vmatmul.mubr.bf16.vlgmr.msra.gmra.mrb[40].mxu1 %v1301_v58 }
 0x676   :  { %1428 = vmatpush1.bf16.msra.mxu0 %v2555_v11  ;;  %1469 = vmatpush1.bf16.msra.mxu1 %v2558_v12  ;;  %v2807_v12 = vld [vmem:[#allocation31_spill] sm:$0xff] }
 0x677   :  { %1429 = vmatprep.subr.bf16.mxu0 %v2561_v25  ;;  %1470 = vmatprep.subr.bf16.mxu1 %v2564_v13  ;;  %v2808_v13 = vld [vmem:[#allocation32_spill] sm:$0xff] }
 0x678   :  { %1459 = vmatprep.mubr.bf16.mxu0 %v2793_v53  ;;  %1500 = vmatprep.mubr.bf16.mxu1 %v2793_v53 }
 0x67a   :  { %1430 = vmatpush1.bf16.msra.mxu0 %v2569_v15  ;;  %1471 = vmatpush1.bf16.msra.mxu1 %v2572_v16 }
 0x67b   :  { %1431 = vmatprep.subr.bf16.mxu0 %v2575_v0  ;;  %1472 = vmatprep.subr.bf16.mxu1 %v2578_v63  ;;  %v2809_v63 = vld [vmem:[#allocation33_spill] sm:$0xff] }
 0x67e   :  { %1432 = vmatpush1.bf16.msra.mxu0 %v2627_v60  ;;  %1473 = vmatpush1.bf16.msra.mxu1 %v2630_v48  ;;  %v2810_v60 = vld [vmem:[#allocation34_spill] sm:$0xff] }
 0x67f   :  { %1433 = vmatprep.subr.bf16.mxu0 %v2633_v42  ;;  %1474 = vmatprep.subr.bf16.mxu1 %v2636_v59 }
 0x682   :  { %1434 = vmatpush1.bf16.msra.mxu0 %v2639_v61  ;;  %1475 = vmatpush1.bf16.msra.mxu1 %v2642_v41 }
 0x683   :  { %1435 = vmatprep.subr.bf16.mxu0 %v2645_v43  ;;  %1476 = vmatprep.subr.bf16.mxu1 %v2648_v8 }
 0x686   :  { %1436 = vmatpush1.bf16.msra.mxu0 %v2651_v9  ;;  %1477 = vmatpush1.bf16.msra.mxu1 %v2654_v10 }
 0x687   :  { %1437 = vmatprep.subr.bf16.mxu0 %v2657_v19  ;;  %1478 = vmatprep.subr.bf16.mxu1 %v2660_v20 }
 0x68a   :  { %1438 = vmatpush1.bf16.msra.mxu0 %v2663_v21  ;;  %1479 = vmatpush1.bf16.msra.mxu1 %v2666_v22 }
 0x68b   :  { %1439 = vmatprep.subr.bf16.mxu0 %v2669_v23  ;;  %1480 = vmatprep.subr.bf16.mxu1 %v2672_v24 }
 0x68e   :  { %1440 = vmatpush1.bf16.msra.mxu0 %v2675_v26  ;;  %1481 = vmatpush1.bf16.msra.mxu1 %v2678_v27 }
 0x68f   :  { %1441 = vmatprep.subr.bf16.mxu0 %v2681_v28  ;;  %1482 = vmatprep.subr.bf16.mxu1 %v2684_v29 }
 0x692   :  { %1442 = vmatpush1.bf16.msra.mxu0 %v2687_v30  ;;  %1483 = vmatpush1.bf16.msra.mxu1 %v2690_v31 }
 0x693   :  { %1747 = vmatprep.subr.bf16.mxu0 %v2086_v32 }
 0x748   :  { %v1336_v53 = vpop.f32.mrb[40].mxu0  ;;  %v1377_v11 = vpop.f32.mrb[40].mxu1 }
 0x749   :  { %v1384_v25 = vadd.f32 %v1336_v53, %v2807_v12  ;;  %v1386_v15 = vadd.f32 %v1377_v11, %v2808_v13  ;;  %v1338_v16 = vpop.f32.mrb[41].mxu0  ;;  %v1379_v0 = vpop.f32.mrb[41].mxu1 }
 0x74a   :  { %v1385_v57 = vadd.f32 %v1338_v16, %v2809_v63  ;;  %v1387_v48 = vadd.f32 %v1379_v0, %v2810_v60  ;;  %v1340_v42 = vpop.f32.mrb[42].mxu0  ;;  %v1381_v59 = vpop.f32.mrb[42].mxu1 }
 0x74b   :  { %v1388_v61 = vpack.c.bf16 %v1384_v25, %v1384_v25  ;;  %v1341_v41 = vpop.f32.mrb[43].mxu0  ;;  %v1382_v43 = vpop.f32.mrb[43].mxu1  ;;  %v1390_v20 = vpack.c.bf16 %v1386_v15, %v1386_v15 }
 0x74c   :  { %v1389_v8 = vpack.c.bf16 %v1385_v57, %v1385_v57  ;;  %v1391_v9 = vpack.c.bf16 %v1387_v48, %v1387_v48 }
 0x74d   :  { %v1392_v10 = vmul.bf16 1056980736, %v1388_v61  ;;  %v1394_v21 = vmul.bf16 1056980736, %v1390_v20 }
 0x74e   :  { %v1393_v19 = vmul.bf16 1056980736, %v1389_v8 }
 0x74f   :  { %1906 = vtanh.bf16 %v1392_v10 }
 0x750   :  { %1908 = vtanh.bf16 %v1391_v9 }
 0x751   :  { %1910 = vtanh.bf16 %v1393_v19 }
 0x752   :  { %1912 = vtanh.bf16 %v1394_v21 }
 0x75a   :  { %v1907_v22 = vpop.eup %1906 }
 0x75b   :  { %v1909_v23 = vpop.eup %1908  ;;  %v1398_v24 = vadd.bf16 1065369472, %v1907_v22 }
 0x75c   :  { %v1911_v26 = vpop.eup %1910  ;;  %v1405_v31 = vunpack.c.l.bf16 %v1909_v23 }
 0x75d   :  { %v1401_v27 = vmul.bf16 1056980736, %v1398_v24  ;;  %v1399_v28 = vadd.bf16 1065369472, %v1911_v26  ;;  %v1913_v56 = vpop.eup %1912 }
 0x75e   :  { %v1400_v4 = vadd.bf16 1065369472, %v1913_v56 }
 0x75f   :  { %v1406_v29 = vunpack.c.l.bf16 %v1401_v27  ;;  %v1402_v30 = vmul.bf16 1056980736, %v1399_v28 }
 0x760   :  { %v1403_v17 = vmul.bf16 1056980736, %v1400_v4 }
 0x761   :  { %v1407_v3 = vunpack.c.l.bf16 %v1402_v30  ;;  %v1410_v50 = vmul.f32 %v1406_v29, %v1405_v31  ;;  %v1729_v31 = vld [vmem:[%s2768_s5] ss:$0 sm:$0xff] }
 0x762   :  { %v1408_v7 = vunpack.c.l.bf16 %v1403_v17 }
 0x763   :  { %v1409_v54 = vmul.f32 %v1407_v3, %v2700_v37 }
 0x765   :  { %v2740_v6 = vadd.f32 %v1410_v50, %v1409_v54 }
 0x767   :  { %1914 = vtanh.f32 %v2740_v6 }
 0x771   :  { %v1915_v18 = vpop.eup %1914 }
 0x772   :  { %v1413_v14 = vmul.f32 %v1915_v18, %v1408_v7 }
 0x774   :  { %v1426_v49 = vpack.c.bf16 %v1413_v14, %v1413_v14 }
 0x776   :  { %1460 = vmatmul.mubr.bf16.vlgmr.msra.gmra.mrb[44].mxu0 %v1426_v49  ;;  %1501 = vmatmul.mubr.bf16.vlgmr.msra.gmra.mrb[44].mxu1 %v1426_v49 }
 0x777   :  { %1748 = vmatpush3.bf16.msra.mxu0 %v1838_v52  ;;  %1763 = vmatprep.mubr.msk.bf16.mxu0 %vm2087_vm1, %v2086_v32 }
 0x778   :  { %1749 = vmatprep.subr.bf16.mxu0 %v2086_v32 }
 0x77b   :  { %1750 = vmatpush3.bf16.msra.mxu0 %v1839_v55 }
 0x77c   :  { %1751 = vmatprep.subr.bf16.mxu0 %v2086_v32 }
 0x77f   :  { %1752 = vmatpush3.bf16.msra.mxu0 %v1840_v51 }
 0x780   :  { %1753 = vmatprep.subr.bf16.mxu0 %v2086_v32 }
 0x783   :  { %1754 = vmatpush3.bf16.msra.mxu0 %v1841_v5 }
 0x784   :  { %1755 = vmatprep.subr.bf16.mxu0 %v2086_v32 }
 0x787   :  { %1756 = vmatpush3.bf16.msra.mxu0 %v1842_v62 }
 0x788   :  { %1757 = vmatprep.subr.bf16.mxu0 %v2086_v32 }
 0x78b   :  { %1758 = vmatpush3.bf16.msra.mxu0 %v1843_v46 }
 0x78c   :  { %1759 = vmatprep.subr.bf16.mxu0 %v2086_v32 }
 0x78f   :  { %1760 = vmatpush3.bf16.msra.mxu0 %v1844_v45 }
 0x790   :  { %1761 = vmatprep.subr.bf16.mxu0 %v2086_v32 }
 0x793   :  { %1762 = vmatpush3.bf16.msra.mxu0 %v1845_v44 }
 0x849   :  { %v1461_v2 = vpop.f32.mrb[44].mxu0  ;;  %v1502_v33 = vpop.f32.mrb[44].mxu1 }
 0x84a   :  { %v1509_v35 = vadd.f32 %v1461_v2, %v2811_v34  ;;  %v1511_v37 = vadd.f32 %v1502_v33, %v2812_v36  ;;  %v1463_v38 = vpop.f32.mrb[45].mxu0  ;;  %v1504_v39 = vpop.f32.mrb[45].mxu1 }
 0x84b   :  { %v1510_v47 = vadd.f32 %v1463_v38, %v2813_v40  ;;  %v1512_v58 = vadd.f32 %v1504_v39, %v2814_v1  ;;  %v1465_v53 = vpop.f32.mrb[46].mxu0  ;;  %v1506_v11 = vpop.f32.mrb[46].mxu1 }
 0x84c   :  { %v1513_v12 = vpack.c.bf16 %v1509_v35, %v1509_v35  ;;  %v1466_v25 = vpop.f32.mrb[47].mxu0  ;;  %v1507_v13 = vpop.f32.mrb[47].mxu1  ;;  %v1515_v57 = vpack.c.bf16 %v1511_v37, %v1511_v37 }
 0x84d   :  { %v1514_v15 = vpack.c.bf16 %v1510_v47, %v1510_v47  ;;  %v1516_v16 = vpack.c.bf16 %v1512_v58, %v1512_v58 }
 0x84e   :  { %v1517_v0 = vmul.bf16 1056980736, %v1513_v12  ;;  %v1519_v60 = vmul.bf16 1056980736, %v1515_v57 }
 0x84f   :  { %v1518_v63 = vmul.bf16 1056980736, %v1514_v15 }
 0x850   :  { %1916 = vtanh.bf16 %v1517_v0 }
 0x851   :  { %1918 = vtanh.bf16 %v1516_v16 }
 0x852   :  { %1920 = vtanh.bf16 %v1518_v63 }
 0x853   :  { %1922 = vtanh.bf16 %v1519_v60 }
 0x85b   :  { %v1917_v48 = vpop.eup %1916 }
 0x85c   :  { %v1919_v42 = vpop.eup %1918  ;;  %v1523_v59 = vadd.bf16 1065369472, %v1917_v48 }
 0x85d   :  { %v1921_v61 = vpop.eup %1920  ;;  %v1530_v10 = vunpack.c.l.bf16 %v1919_v42 }
 0x85e   :  { %v1526_v41 = vmul.bf16 1056980736, %v1523_v59  ;;  %v1524_v43 = vadd.bf16 1065369472, %v1921_v61  ;;  %v1923_v22 = vpop.eup %1922 }
 0x85f   :  { %v1525_v24 = vadd.bf16 1065369472, %v1923_v22 }
 0x860   :  { %v1531_v8 = vunpack.c.l.bf16 %v1526_v41  ;;  %v1527_v9 = vmul.bf16 1056980736, %v1524_v43 }
 0x861   :  { %v1528_v26 = vmul.bf16 1056980736, %v1525_v24 }
 0x862   :  { %v1532_v19 = vunpack.c.l.bf16 %v1527_v9  ;;  %v1535_v20 = vmul.f32 %v1531_v8, %v1530_v10 }
 0x863   :  { %v1533_v27 = vunpack.c.l.bf16 %v1528_v26 }
 0x864   :  { %v1534_v21 = vmul.f32 %v1532_v19, %v2740_v6 }
 0x866   :  { %v1536_v23 = vadd.f32 %v1535_v20, %v1534_v21 }
 0x868   :  { %1924 = vtanh.f32 %v1536_v23 }
 0x872   :  { %v1925_v28 = vpop.eup %1924 }
 0x873   :  { %v1538_v29 = vmul.f32 %v1925_v28, %v1533_v27 }
 0x875   :  { %v1551_v30 = vpack.c.bf16 %v1538_v29, %v1538_v29 }
 0x877   :  { %1764 = vmatmul.mubr.bf16.vlgmr.msra.gmra.mrb[48].mxu0 %v1551_v30 }
 0x94a   :  { %v1657_v3 = vpop.f32.mrb[48].mxu0 }
 0x94b   :  { %v1658_v50 = vadd.f32 %v1729_v31, %v1657_v3  ;;  %v1765_v54 = vpop.f32.mrb[49].mxu0 }
 0x94c   :  { %v1660_v56 = vpop.f32.mrb[50].mxu0 }
 0x94d   :  { %1663 = vst [vmem:[#allocation13] sm:$0xff] %v1658_v50  ;;  %v1766_v6 = vpop.f32.mrb[51].mxu0 }
 0x94e   :  { %2057 = shalt.err (!%p2054_p8)
}
 0x94f   :  { %s2058_s5 = scalar_lea.hbm %s2769_s6, 128 }
 0x950   :  { %p2059_p9 = scmp.ne.s32.totalorder %s2769_s6, %s2058_s5  ;;  %p2062_p10 = scmp.lt.u32.totalorder %s2058_s5, %s2769_s6 }
 0x952   :  { %p2064_p11 = pnand %p2062_p10, %p2059_p9 }
 0x954   :  { %2067 = shalt.err (!%p2064_p11)
}
 0x955   :  { %1673 = dma.vmem_to_hbm [thread:$0]  %s1671_s24, 128, %s2769_s6, [#allocation7]  }
 0x956   :  { %2074 = dma.done.wait [#allocation7], 128  }
 0x957   :  { %2075 = vsyncadd [#allocation7], 4294967168 }
 0x958   :  { %1677 = vsyncpa [#allocation6], 1 }
 0x959   :  { %1678 = vsyncpa [#allocation9], 1 }
 0x95a   :  { %1679 = vsyncpa [#allocation12], 1 }
 0x95b   :  { %1680 = vsyncpa [#allocation7], 1 }

</bundles_post_ra>
